<compile_context>
chip_gen: v7x
topology: tpu7x:2x2x1
jax: 0.10.0
libtpu: 0.0.40
codegen_flags: <defaults>
</compile_context>

<pallas_src>
import functools

import jax
import jax.numpy as jnp
from jax.experimental import pallas as pl
from jax.experimental.pallas import tpu as pltpu

EPS = 1e-5


def _triangle_update_kernel(x_ref, wz_ref, wo_ref, vec_ref, out_ref, *, N, C, H):
    P = 4 * H + C                                     # fused projection width
    x = x_ref[...]                                    # (N*N, C)

    # ---- packed parameter rows (static slices of the (2, L) pack) ----
    b_z  = vec_ref[0:1, 0:P]                          # fused bias  (1, 4H+C)
    zn_g = vec_ref[1:2, 0:C]
    zn_b = vec_ref[1:2, C:2 * C]
    ln_g = vec_ref[1:2, 2 * C:2 * C + H]
    ln_b = vec_ref[1:2, 2 * C + H:2 * C + 2 * H]
    o_b  = vec_ref[1:2, 2 * C + 2 * H:3 * C + 2 * H]

    # ---- z_norm (LayerNorm over pair_dim) ----
    mu = jnp.mean(x, axis=-1, keepdims=True)
    var = jnp.mean((x - mu) ** 2, axis=-1, keepdims=True)
    z = (x - mu) * jax.lax.rsqrt(var + EPS)
    z = z * zn_g + zn_b                               # (N*N, C)

    # ---- ONE fused projection: columns [a | b | ga | gb | g] ----
    proj = jnp.dot(z, wz_ref[...], preferred_element_type=jnp.float32) + b_z
    sig = jax.nn.sigmoid(proj)                        # full-width sigmoid (EUP)
    gated = proj[:, 0:2 * H] * sig[:, 2 * H:4 * H]    # [a*sig(ga) | b*sig(gb)]
    gate_out = sig[:, 4 * H:4 * H + C]                # sigmoid(z @ g_w + g_b)

    n1 = gated[:, 0:H].reshape(N, N, H)               # indexed (i, k, h)
    n2 = gated[:, H:2 * H].reshape(N, N, H)           # indexed (j, k, h)

    # ---- triangle contraction: pu[i,j,h] = sum_k n1[i,k,h] * n2[j,k,h] ----
    # Row-by-row over i: only an (N, N, H) slab is live per step; no 4-D
    # (N,N,N,H) intermediate, so the vreg file is never exhausted.
    rows = []
    for i in range(N):
        prod = n2 * n1[i][None, :, :]                 # (N_j, N_k, H)
        rows.append(jnp.sum(prod, axis=1))            # (N_j, H)
    pu = jnp.concatenate(rows, axis=0)                # (N*N, H), row = i*N + j

    # ---- layer_norm over hidden ----
    mu2 = jnp.mean(pu, axis=-1, keepdims=True)
    var2 = jnp.mean((pu - mu2) ** 2, axis=-1, keepdims=True)
    pun = (pu - mu2) * jax.lax.rsqrt(var2 + EPS)
    pun = pun * ln_g + ln_b

    # ---- output projection + output gate ----
    out = jnp.dot(pun, wo_ref[...], preferred_element_type=jnp.float32) + o_b
    out_ref[...] = out * gate_out                     # (N*N, C)


def _pad_row(v, width):
    return jnp.pad(v, (0, width - v.shape[0]))


def triangle_update_outgoing(pair_embed, p):
    N, _, C = pair_embed.shape
    H = p["a_w"].shape[1]
    P = 4 * H + C
    L = max(P, 3 * C + 2 * H)

    # Pack once in the wrapper (outside the kernel hot path).
    w_z = jnp.concatenate(
        [p["a_w"], p["b_w"], p["ga_w"], p["gb_w"], p["g_w"]], axis=1)       # (C, 4H+C)
    b_z = jnp.concatenate(
        [p["a_b"], p["b_b"], p["ga_b"], p["gb_b"], p["g_b"]], axis=0)       # (4H+C,)
    row1 = jnp.concatenate(
        [p["zn_g"], p["zn_b"], p["ln_g"], p["ln_b"], p["o_b"]], axis=0)     # (3C+2H,)
    vecs = jnp.stack([_pad_row(b_z, L), _pad_row(row1, L)], axis=0)         # (2, L)

    x2 = pair_embed.reshape(N * N, C)

    kernel = functools.partial(_triangle_update_kernel, N=N, C=C, H=H)
    out = pl.pallas_call(
        kernel,
        out_shape=jax.ShapeDtypeStruct((N * N, C), jnp.float32),
        in_specs=[pl.BlockSpec(memory_space=pltpu.MemorySpace.VMEM)] * 4,
        out_specs=pl.BlockSpec(memory_space=pltpu.MemorySpace.VMEM),
    )(x2, w_z, p["o_w"], vecs)
    return out.reshape(N, N, C)


def reference(pair_embed, p):
    """Pure-JAX reference mirroring the PyTorch forward."""
    def ln(x, g, b):
        mu = x.mean(-1, keepdims=True)
        var = ((x - mu) ** 2).mean(-1, keepdims=True)
        return (x - mu) / jnp.sqrt(var + EPS) * g + b

    z = ln(pair_embed, p["zn_g"], p["zn_b"])
    n1 = (z @ p["a_w"] + p["a_b"]) * jax.nn.sigmoid(z @ p["ga_w"] + p["ga_b"])
    n2 = (z @ p["b_w"] + p["b_b"]) * jax.nn.sigmoid(z @ p["gb_w"] + p["gb_b"])
    pu = jnp.einsum("ikh,jkh->ijh", n1, n2)
    pu = ln(pu, p["ln_g"], p["ln_b"])
    pu = pu @ p["o_w"] + p["o_b"]
    gate = jax.nn.sigmoid(z @ p["g_w"] + p["g_b"])
    return pu * gate


def make_params(key, pair_dim, hidden_dim):
    ks = jax.random.split(key, 16)
    f32 = jnp.float32
    scale = 0.1
    return {
        "zn_g": 1.0 + scale * jax.random.normal(ks[0], (pair_dim,), f32),
        "zn_b": scale * jax.random.normal(ks[1], (pair_dim,), f32),
        "a_w": scale * jax.random.normal(ks[2], (pair_dim, hidden_dim), f32),
        "a_b": scale * jax.random.normal(ks[3], (hidden_dim,), f32),
        "ga_w": scale * jax.random.normal(ks[4], (pair_dim, hidden_dim), f32),
        "ga_b": scale * jax.random.normal(ks[5], (hidden_dim,), f32),
        "b_w": scale * jax.random.normal(ks[6], (pair_dim, hidden_dim), f32),
        "b_b": scale * jax.random.normal(ks[7], (hidden_dim,), f32),
        "gb_w": scale * jax.random.normal(ks[8], (pair_dim, hidden_dim), f32),
        "gb_b": scale * jax.random.normal(ks[9], (hidden_dim,), f32),
        "ln_g": 1.0 + scale * jax.random.normal(ks[10], (hidden_dim,), f32),
        "ln_b": scale * jax.random.normal(ks[11], (hidden_dim,), f32),
        "o_w": scale * jax.random.normal(ks[12], (hidden_dim, pair_dim), f32),
        "o_b": scale * jax.random.normal(ks[13], (pair_dim,), f32),
        "g_w": scale * jax.random.normal(ks[14], (pair_dim, pair_dim), f32),
        "g_b": scale * jax.random.normal(ks[15], (pair_dim,), f32),
    }


if __name__ == "__main__":
    N = 8            # sequence length (pair rows/cols)
    PAIR_DIM = 32    # global_config['pair_dim']
    HIDDEN_DIM = 32  # tri_out_config['hidden_dim']

    key = jax.random.PRNGKey(0)
    k_x, k_p = jax.random.split(key)
    pair_embed = jax.random.normal(k_x, (N, N, PAIR_DIM), jnp.float32)
    params = make_params(k_p, PAIR_DIM, HIDDEN_DIM)

    out = triangle_update_outgoing(pair_embed, params)
    out = jax.block_until_ready(out)

    ref = jax.block_until_ready(reference(pair_embed, params))
    assert out.shape == (N, N, PAIR_DIM)
    assert jnp.allclose(out, ref, rtol=1e-4, atol=1e-4), (
        f"max abs err {jnp.max(jnp.abs(out - ref))}")

    print("KERNEL_OK")
</pallas_src>

<mosaic_0001>
module attributes {stable_mosaic.version = 11 : i64} {
  func.func @_triangle_update_kernel(%arg0: memref<64x32xf32, #tpu.memory_space<vmem>>, %arg1: memref<32x160xf32, #tpu.memory_space<vmem>>, %arg2: memref<32x32xf32, #tpu.memory_space<vmem>>, %arg3: memref<2x160xf32, #tpu.memory_space<vmem>>, %arg4: memref<64x32xf32, #tpu.memory_space<vmem>>) attributes {dimension_semantics = [], scalar_prefetch = 0 : i64, scratch_operands = 0 : i64, tpu.core_type = #tpu.core_type<tc>} {
    %c0 = arith.constant 0 : index
    %c0_0 = arith.constant 0 : index
    %0 = vector.load %arg0[%c0, %c0_0] : memref<64x32xf32, #tpu.memory_space<vmem>>, vector<64x32xf32>
    %c0_1 = arith.constant 0 : index
    %c0_2 = arith.constant 0 : index
    %1 = vector.load %arg3[%c0_1, %c0_2] : memref<2x160xf32, #tpu.memory_space<vmem>>, vector<1x160xf32>
    %c1 = arith.constant 1 : index
    %c0_3 = arith.constant 0 : index
    %2 = vector.load %arg3[%c1, %c0_3] : memref<2x160xf32, #tpu.memory_space<vmem>>, vector<1x32xf32>
    %c1_4 = arith.constant 1 : index
    %c32 = arith.constant 32 : index
    %3 = vector.load %arg3[%c1_4, %c32] : memref<2x160xf32, #tpu.memory_space<vmem>>, vector<1x32xf32>
    %c1_5 = arith.constant 1 : index
    %c64 = arith.constant 64 : index
    %4 = vector.load %arg3[%c1_5, %c64] : memref<2x160xf32, #tpu.memory_space<vmem>>, vector<1x32xf32>
    %c1_6 = arith.constant 1 : index
    %c96 = arith.constant 96 : index
    %5 = vector.load %arg3[%c1_6, %c96] : memref<2x160xf32, #tpu.memory_space<vmem>>, vector<1x32xf32>
    %c1_7 = arith.constant 1 : index
    %c128 = arith.constant 128 : index
    %6 = vector.load %arg3[%c1_7, %c128] : memref<2x160xf32, #tpu.memory_space<vmem>>, vector<1x32xf32>
    %cst = arith.constant dense<0.000000e+00> : vector<64xf32>
    %7 = vector.multi_reduction <add>, %0, %cst [1] : vector<64x32xf32> to vector<64xf32>
    %8 = vector.shape_cast %7 : vector<64xf32> to vector<64x1xf32>
    %cst_8 = arith.constant 3.200000e+01 : f32
    %9 = vector.broadcast %cst_8 : f32 to vector<64x1xf32>
    %10 = arith.divf %8, %9 : vector<64x1xf32>
    %11 = vector.broadcast %10 : vector<64x1xf32> to vector<64x32xf32>
    %12 = arith.subf %0, %11 : vector<64x32xf32>
    %13 = arith.mulf %12, %12 : vector<64x32xf32>
    %cst_9 = arith.constant dense<0.000000e+00> : vector<64xf32>
    %14 = vector.multi_reduction <add>, %13, %cst_9 [1] : vector<64x32xf32> to vector<64xf32>
    %15 = vector.shape_cast %14 : vector<64xf32> to vector<64x1xf32>
    %cst_10 = arith.constant 3.200000e+01 : f32
    %16 = vector.broadcast %cst_10 : f32 to vector<64x1xf32>
    %17 = arith.divf %15, %16 : vector<64x1xf32>
    %18 = vector.broadcast %10 : vector<64x1xf32> to vector<64x32xf32>
    %19 = arith.subf %0, %18 : vector<64x32xf32>
    %cst_11 = arith.constant 9.99999974E-6 : f32
    %20 = vector.broadcast %cst_11 : f32 to vector<64x1xf32>
    %21 = arith.addf %17, %20 : vector<64x1xf32>
    %22 = math.rsqrt %21 : vector<64x1xf32>
    %23 = vector.broadcast %22 : vector<64x1xf32> to vector<64x32xf32>
    %24 = arith.mulf %19, %23 : vector<64x32xf32>
    %25 = vector.broadcast %2 : vector<1x32xf32> to vector<64x32xf32>
    %26 = arith.mulf %24, %25 : vector<64x32xf32>
    %27 = vector.broadcast %3 : vector<1x32xf32> to vector<64x32xf32>
    %28 = arith.addf %26, %27 : vector<64x32xf32>
    %c0_12 = arith.constant 0 : index
    %c0_13 = arith.constant 0 : index
    %29 = vector.load %arg1[%c0_12, %c0_13] : memref<32x160xf32, #tpu.memory_space<vmem>>, vector<32x160xf32>
    %cst_14 = arith.constant dense<0.000000e+00> : vector<64x160xf32>
    %30 = tpu.matmul %28, %29, %cst_14 {dimension_numbers = #tpu.dot_dimension_numbers<[1], [0], [0], [1], [0, 0, 1, 1], [], []>} : vector<64x32xf32>, vector<32x160xf32>, vector<64x160xf32> -> vector<64x160xf32>
    %31 = vector.broadcast %1 : vector<1x160xf32> to vector<64x160xf32>
    %32 = arith.addf %30, %31 : vector<64x160xf32>
    %33 = arith.negf %32 : vector<64x160xf32>
    %34 = math.exp %33 : vector<64x160xf32>
    %cst_15 = arith.constant 1.000000e+00 : f32
    %35 = vector.broadcast %cst_15 : f32 to vector<64x160xf32>
    %36 = arith.addf %35, %34 : vector<64x160xf32>
    %37 = arith.divf %35, %36 : vector<64x160xf32>
    %38 = vector.extract_strided_slice %32 {offsets = [0, 0], sizes = [64, 64], strides = [1, 1]} : vector<64x160xf32> to vector<64x64xf32>
    %39 = vector.extract_strided_slice %37 {offsets = [0, 64], sizes = [64, 64], strides = [1, 1]} : vector<64x160xf32> to vector<64x64xf32>
    %40 = arith.mulf %38, %39 : vector<64x64xf32>
    %41 = vector.extract_strided_slice %37 {offsets = [0, 128], sizes = [64, 32], strides = [1, 1]} : vector<64x160xf32> to vector<64x32xf32>
    %42 = vector.extract_strided_slice %40 {offsets = [0, 0], sizes = [64, 32], strides = [1, 1]} : vector<64x64xf32> to vector<64x32xf32>
    %43 = vector.shape_cast %42 : vector<64x32xf32> to vector<8x8x32xf32>
    %44 = vector.extract_strided_slice %40 {offsets = [0, 32], sizes = [64, 32], strides = [1, 1]} : vector<64x64xf32> to vector<64x32xf32>
    %45 = vector.shape_cast %44 : vector<64x32xf32> to vector<8x8x32xf32>
    %46 = vector.extract_strided_slice %43 {offsets = [0, 0, 0], sizes = [1, 8, 32], strides = [1, 1, 1]} : vector<8x8x32xf32> to vector<1x8x32xf32>
    %47 = vector.shape_cast %46 : vector<1x8x32xf32> to vector<8x32xf32>
    %48 = vector.shape_cast %47 : vector<8x32xf32> to vector<1x8x32xf32>
    %49 = vector.broadcast %48 : vector<1x8x32xf32> to vector<8x8x32xf32>
    %50 = arith.mulf %45, %49 : vector<8x8x32xf32>
    %cst_16 = arith.constant dense<0.000000e+00> : vector<8x32xf32>
    %51 = vector.multi_reduction <add>, %50, %cst_16 [1] : vector<8x8x32xf32> to vector<8x32xf32>
    %52 = vector.extract_strided_slice %43 {offsets = [1, 0, 0], sizes = [1, 8, 32], strides = [1, 1, 1]} : vector<8x8x32xf32> to vector<1x8x32xf32>
    %53 = vector.shape_cast %52 : vector<1x8x32xf32> to vector<8x32xf32>
    %54 = vector.shape_cast %53 : vector<8x32xf32> to vector<1x8x32xf32>
    %55 = vector.broadcast %54 : vector<1x8x32xf32> to vector<8x8x32xf32>
    %56 = arith.mulf %45, %55 : vector<8x8x32xf32>
    %cst_17 = arith.constant dense<0.000000e+00> : vector<8x32xf32>
    %57 = vector.multi_reduction <add>, %56, %cst_17 [1] : vector<8x8x32xf32> to vector<8x32xf32>
    %58 = vector.extract_strided_slice %43 {offsets = [2, 0, 0], sizes = [1, 8, 32], strides = [1, 1, 1]} : vector<8x8x32xf32> to vector<1x8x32xf32>
    %59 = vector.shape_cast %58 : vector<1x8x32xf32> to vector<8x32xf32>
    %60 = vector.shape_cast %59 : vector<8x32xf32> to vector<1x8x32xf32>
    %61 = vector.broadcast %60 : vector<1x8x32xf32> to vector<8x8x32xf32>
    %62 = arith.mulf %45, %61 : vector<8x8x32xf32>
    %cst_18 = arith.constant dense<0.000000e+00> : vector<8x32xf32>
    %63 = vector.multi_reduction <add>, %62, %cst_18 [1] : vector<8x8x32xf32> to vector<8x32xf32>
    %64 = vector.extract_strided_slice %43 {offsets = [3, 0, 0], sizes = [1, 8, 32], strides = [1, 1, 1]} : vector<8x8x32xf32> to vector<1x8x32xf32>
    %65 = vector.shape_cast %64 : vector<1x8x32xf32> to vector<8x32xf32>
    %66 = vector.shape_cast %65 : vector<8x32xf32> to vector<1x8x32xf32>
    %67 = vector.broadcast %66 : vector<1x8x32xf32> to vector<8x8x32xf32>
    %68 = arith.mulf %45, %67 : vector<8x8x32xf32>
    %cst_19 = arith.constant dense<0.000000e+00> : vector<8x32xf32>
    %69 = vector.multi_reduction <add>, %68, %cst_19 [1] : vector<8x8x32xf32> to vector<8x32xf32>
    %70 = vector.extract_strided_slice %43 {offsets = [4, 0, 0], sizes = [1, 8, 32], strides = [1, 1, 1]} : vector<8x8x32xf32> to vector<1x8x32xf32>
    %71 = vector.shape_cast %70 : vector<1x8x32xf32> to vector<8x32xf32>
    %72 = vector.shape_cast %71 : vector<8x32xf32> to vector<1x8x32xf32>
    %73 = vector.broadcast %72 : vector<1x8x32xf32> to vector<8x8x32xf32>
    %74 = arith.mulf %45, %73 : vector<8x8x32xf32>
    %cst_20 = arith.constant dense<0.000000e+00> : vector<8x32xf32>
    %75 = vector.multi_reduction <add>, %74, %cst_20 [1] : vector<8x8x32xf32> to vector<8x32xf32>
    %76 = vector.extract_strided_slice %43 {offsets = [5, 0, 0], sizes = [1, 8, 32], strides = [1, 1, 1]} : vector<8x8x32xf32> to vector<1x8x32xf32>
    %77 = vector.shape_cast %76 : vector<1x8x32xf32> to vector<8x32xf32>
    %78 = vector.shape_cast %77 : vector<8x32xf32> to vector<1x8x32xf32>
    %79 = vector.broadcast %78 : vector<1x8x32xf32> to vector<8x8x32xf32>
    %80 = arith.mulf %45, %79 : vector<8x8x32xf32>
    %cst_21 = arith.constant dense<0.000000e+00> : vector<8x32xf32>
    %81 = vector.multi_reduction <add>, %80, %cst_21 [1] : vector<8x8x32xf32> to vector<8x32xf32>
    %82 = vector.extract_strided_slice %43 {offsets = [6, 0, 0], sizes = [1, 8, 32], strides = [1, 1, 1]} : vector<8x8x32xf32> to vector<1x8x32xf32>
    %83 = vector.shape_cast %82 : vector<1x8x32xf32> to vector<8x32xf32>
    %84 = vector.shape_cast %83 : vector<8x32xf32> to vector<1x8x32xf32>
    %85 = vector.broadcast %84 : vector<1x8x32xf32> to vector<8x8x32xf32>
    %86 = arith.mulf %45, %85 : vector<8x8x32xf32>
    %cst_22 = arith.constant dense<0.000000e+00> : vector<8x32xf32>
    %87 = vector.multi_reduction <add>, %86, %cst_22 [1] : vector<8x8x32xf32> to vector<8x32xf32>
    %88 = vector.extract_strided_slice %43 {offsets = [7, 0, 0], sizes = [1, 8, 32], strides = [1, 1, 1]} : vector<8x8x32xf32> to vector<1x8x32xf32>
    %89 = vector.shape_cast %88 : vector<1x8x32xf32> to vector<8x32xf32>
    %90 = vector.shape_cast %89 : vector<8x32xf32> to vector<1x8x32xf32>
    %91 = vector.broadcast %90 : vector<1x8x32xf32> to vector<8x8x32xf32>
    %92 = arith.mulf %45, %91 : vector<8x8x32xf32>
    %cst_23 = arith.constant dense<0.000000e+00> : vector<8x32xf32>
    %93 = vector.multi_reduction <add>, %92, %cst_23 [1] : vector<8x8x32xf32> to vector<8x32xf32>
    %94 = tpu.concatenate %51, %57, %63, %69, %75, %81, %87, %93 in 0 : vector<8x32xf32>, vector<8x32xf32>, vector<8x32xf32>, vector<8x32xf32>, vector<8x32xf32>, vector<8x32xf32>, vector<8x32xf32>, vector<8x32xf32> -> vector<64x32xf32>
    %cst_24 = arith.constant dense<0.000000e+00> : vector<64xf32>
    %95 = vector.multi_reduction <add>, %94, %cst_24 [1] : vector<64x32xf32> to vector<64xf32>
    %96 = vector.shape_cast %95 : vector<64xf32> to vector<64x1xf32>
    %cst_25 = arith.constant 3.200000e+01 : f32
    %97 = vector.broadcast %cst_25 : f32 to vector<64x1xf32>
    %98 = arith.divf %96, %97 : vector<64x1xf32>
    %99 = vector.broadcast %98 : vector<64x1xf32> to vector<64x32xf32>
    %100 = arith.subf %94, %99 : vector<64x32xf32>
    %101 = arith.mulf %100, %100 : vector<64x32xf32>
    %cst_26 = arith.constant dense<0.000000e+00> : vector<64xf32>
    %102 = vector.multi_reduction <add>, %101, %cst_26 [1] : vector<64x32xf32> to vector<64xf32>
    %103 = vector.shape_cast %102 : vector<64xf32> to vector<64x1xf32>
    %cst_27 = arith.constant 3.200000e+01 : f32
    %104 = vector.broadcast %cst_27 : f32 to vector<64x1xf32>
    %105 = arith.divf %103, %104 : vector<64x1xf32>
    %106 = vector.broadcast %98 : vector<64x1xf32> to vector<64x32xf32>
    %107 = arith.subf %94, %106 : vector<64x32xf32>
    %cst_28 = arith.constant 9.99999974E-6 : f32
    %108 = vector.broadcast %cst_28 : f32 to vector<64x1xf32>
    %109 = arith.addf %105, %108 : vector<64x1xf32>
    %110 = math.rsqrt %109 : vector<64x1xf32>
    %111 = vector.broadcast %110 : vector<64x1xf32> to vector<64x32xf32>
    %112 = arith.mulf %107, %111 : vector<64x32xf32>
    %113 = vector.broadcast %4 : vector<1x32xf32> to vector<64x32xf32>
    %114 = arith.mulf %112, %113 : vector<64x32xf32>
    %115 = vector.broadcast %5 : vector<1x32xf32> to vector<64x32xf32>
    %116 = arith.addf %114, %115 : vector<64x32xf32>
    %c0_29 = arith.constant 0 : index
    %c0_30 = arith.constant 0 : index
    %117 = vector.load %arg2[%c0_29, %c0_30] : memref<32x32xf32, #tpu.memory_space<vmem>>, vector<32x32xf32>
    %cst_31 = arith.constant dense<0.000000e+00> : vector<64x32xf32>
    %118 = tpu.matmul %116, %117, %cst_31 {dimension_numbers = #tpu.dot_dimension_numbers<[1], [0], [0], [1], [0, 0, 1, 1], [], []>} : vector<64x32xf32>, vector<32x32xf32>, vector<64x32xf32> -> vector<64x32xf32>
    %119 = vector.broadcast %6 : vector<1x32xf32> to vector<64x32xf32>
    %120 = arith.addf %118, %119 : vector<64x32xf32>
    %121 = arith.mulf %120, %41 : vector<64x32xf32>
    %c0_32 = arith.constant 0 : index
    %c0_33 = arith.constant 0 : index
    %122 = vector.load %arg4[%c0_32, %c0_33] : memref<64x32xf32, #tpu.memory_space<vmem>>, vector<64x32xf32>
    tpu.vector_store %arg4[%c0_32, %c0_33], %121 {strides = array<i32>} : memref<64x32xf32, #tpu.memory_space<vmem>>, vector<64x32xf32>,
    return
  }
}

</mosaic_0001>

<bundles_post_ra>
// kernel: tpu_custom_call.1
= control target key start
LH: loop header
LB: loop body
LE: loop exit
PB: predicated region body
PF: predicated region fallthrough
CT: control target
= control target key end

     0   :  { %vm28_vm0 = vcmask 261120   ;;  %v167_v16 = vlaneseq  ;;  %s1669_s24 = smov 96   ;;  %s1672_s25 = smov 32   ;;  %vm462_vm1 = vcmask 523520   ;;  %vm1003_vm2 = vcmask 1041409   ;;  %s2543_s0 = inlined_call_operand.vmem [shape: f32[64,32], index: 0, kind: input, shape index: {}]   ;;  %s2544_s3 = inlined_call_operand.vmem [shape: f32[2,160], index: 3, kind: input, shape index: {}]   ;;  %s2545_s1 = inlined_call_operand.vmem [shape: f32[32,160], index: 1, kind: input, shape index: {}]   ;;  %s2546_s2 = inlined_call_operand.vmem [shape: f32[32,32], index: 2, kind: input, shape index: {}]   ;;  %s2547_s4 = inlined_call_operand.vmem [shape: f32[64,32], index: 4, kind: output, shape index: {}]  }
   0x1   :  { %v17_v0 = vld [vmem:[%s2543_s0] sm:$0xff]  ;;  %v19_v1 = vld [vmem:[%s2543_s0 + $0x10] sm:$0xff]  ;;  %v18_v2 = vld [vmem:[%s2543_s0 + $0x8] sm:$0xff]  ;;  %vm1005_vm3 = vcmask 1042434   ;;  %vm1007_vm4 = vcmask 1043459   ;;  %vm1009_vm5 = vcmask 1044484  }
   0x2   :  { %v29_v3 = vsel %vm28_vm0, %v17_v0, 0.0  ;;  %v35_v4 = vsel %vm28_vm0, %v19_v1, 0.0  ;;  %v20_v5 = vld [vmem:[%s2543_s0 + $0x18] sm:$0xff]  ;;  %v32_v6 = vsel %vm28_vm0, %v18_v2, 0.0  ;;  %v21_v8 = vld [vmem:[%s2543_s0 + $0x20] sm:$0xff]  ;;  %v22_v9 = vld [vmem:[%s2543_s0 + $0x28] sm:$0xff] }
   0x3   :  { %30 = vadd.xlane.f32.xlu0 %v29_v3  ;;  %36 = vadd.xlane.f32.xlu1 %v35_v4  ;;  %v38_v7 = vsel %vm28_vm0, %v20_v5, 0.0  ;;  %v41_v10 = vsel %vm28_vm0, %v21_v8, 0.0  ;;  %v44_v11 = vsel %vm28_vm0, %v22_v9, 0.0  ;;  %v23_v12 = vld [vmem:[%s2543_s0 + $0x30] sm:$0xff]  ;;  %v24_v13 = vld [vmem:[%s2543_s0 + $0x38] sm:$0xff]  ;;  %v1730_v17 = vshrl.u32 %v167_v16, 7 }
   0x4   :  { %v47_v14 = vsel %vm28_vm0, %v23_v12, 0.0  ;;  %v50_v15 = vsel %vm28_vm0, %v24_v13, 0.0  ;;  %v1735_v18 = vld [vmem:[%s2544_s3] ss:$2 sm:$0x3]  ;;  %v159_v61 = vld [vmem:[%s2545_s1 + $0x8] sm:$0xff] }
   0x5   :  { %v173_v19 = vsub.s32 1, %v1730_v17  ;;  %v161_v62 = vld [vmem:[%s2545_s1 + $0x18] sm:$0xff]  ;;  %v163_v3 = vld [vmem:[%s2545_s1 + $0x28] sm:$0xff]  ;;  %vm1011_vm6 = vcmask 1045509   ;;  %vm1013_vm7 = vcmask 1046534   ;;  %vm1015_vm8 = vcmask 1047559  }
   0x6   :  { %v1548_v63 = vpack.c.bf16 %v161_v62, %v159_v61  ;;  %v165_v4 = vld [vmem:[%s2545_s1 + $0x38] sm:$0xff] }
   0x7   :  { %33 = vadd.xlane.f32.xlu0 %v32_v6  ;;  %39 = vadd.xlane.f32.xlu1 %v38_v7  ;;  %v1739_v20 = vrot.slane %v1735_v18, %v173_v19  ;;  %v162_v6 = vld [vmem:[%s2545_s1 + $0x20] sm:$0xff]  ;;  %v164_v7 = vld [vmem:[%s2545_s1 + $0x30] sm:$0xff] }
   0x8   :  { %1549 = vmatprep.subr.bf16.mxu0 %v1548_v63  ;;  %1564 = vmatprep.subr.bf16.mxu1 %v1548_v63 }
   0xb   :  { %42 = vadd.xlane.f32.xlu0 %v41_v10  ;;  %45 = vadd.xlane.f32.xlu1 %v44_v11  ;;  %v1670_v10 = vmov 0.0  }
   0xc   :  { %265 = vmatprep.mubr.f32.mxu0 %v1670_v10  ;;  %301 = vmatprep.mubr.f32.mxu1 %v1670_v10 }
   0xf   :  { %48 = vadd.xlane.f32.xlu0 %v47_v14  ;;  %51 = vadd.xlane.f32.xlu1 %v50_v15 }
  0x90   :  { %v31_v21 = vpop.xlane.xlu0 %30  ;;  %v37_v22 = vpop.xlane.xlu1 %36 }
  0x91   :  { %v54_v23 = vmul.f32 0.03125, %v31_v21  ;;  %v56_v24 = vmul.f32 0.03125, %v37_v22 }
  0x93   :  { %v1741_v25 = vsub.f32 %v17_v0, %v54_v23  ;;  %v1743_v26 = vsub.f32 %v19_v1, %v56_v24  ;;  %v158_v0 = vld [vmem:[%s2545_s1] sm:$0xff]  ;;  %v160_v1 = vld [vmem:[%s2545_s1 + $0x10] sm:$0xff]  ;;  %s1671_s1 = smov 64  }
  0x94   :  { %v34_v27 = vpop.xlane.xlu0 %33  ;;  %v40_v28 = vpop.xlane.xlu1 %39 }
  0x95   :  { %v55_v29 = vmul.f32 0.03125, %v34_v27  ;;  %v57_v30 = vmul.f32 0.03125, %v40_v28  ;;  %v70_v31 = vmul.f32 %v1741_v25, %v1741_v25  ;;  %v72_v32 = vmul.f32 %v1743_v26, %v1743_v26 }
  0x97   :  { %v1749_v33 = vsub.f32 %v18_v2, %v55_v29  ;;  %v1751_v34 = vsub.f32 %v20_v5, %v57_v30  ;;  %v78_v35 = vsel %vm28_vm0, %v70_v31, 0.0  ;;  %v84_v38 = vsel %vm28_vm0, %v72_v32, 0.0 }
  0x98   :  { %79 = vadd.xlane.f32.xlu0 %v78_v35  ;;  %v43_v36 = vpop.xlane.xlu0 %42  ;;  %v46_v37 = vpop.xlane.xlu1 %45  ;;  %v1550_v2 = vpack.c.bf16 %v160_v1, %v158_v0  ;;  %v1552_v5 = vpack.c.bf16 %v165_v4, %v163_v3 }
  0x99   :  { %v58_v39 = vmul.f32 0.03125, %v43_v36  ;;  %v59_v40 = vmul.f32 0.03125, %v46_v37  ;;  %v71_v41 = vmul.f32 %v1749_v33, %v1749_v33  ;;  %v73_v42 = vmul.f32 %v1751_v34, %v1751_v34 }
  0x9a   :  { %1551 = vmatpush1.bf16.msra.mxu0 %v1550_v2  ;;  %1566 = vmatpush1.bf16.msra.mxu1 %v1550_v2 }
  0x9b   :  { %v1759_v43 = vsub.f32 %v21_v8, %v58_v39  ;;  %v1761_v44 = vsub.f32 %v22_v9, %v59_v40  ;;  %v81_v45 = vsel %vm28_vm0, %v71_v41, 0.0  ;;  %v87_v48 = vsel %vm28_vm0, %v73_v42, 0.0  ;;  %v1808_v8 = vld [vmem:[%s2544_s3 + $0x1] ss:$0 sm:$0xff]  ;;  %1553 = vmatprep.subr.bf16.mxu0 %v1552_v5  ;;  %1565 = vmatprep.subr.bf16.mxu1 %v1552_v5 }
  0x9c   :  { %85 = vadd.xlane.f32.xlu0 %v84_v38  ;;  %82 = vadd.xlane.f32.xlu1 %v81_v45  ;;  %v49_v46 = vpop.xlane.xlu0 %48  ;;  %v52_v47 = vpop.xlane.xlu1 %51  ;;  %v1554_v9 = vpack.c.bf16 %v164_v7, %v162_v6  ;;  %v169_v7 = vsub.s32 0, %v1730_v17 }
  0x9d   :  { %v60_v49 = vmul.f32 0.03125, %v49_v46  ;;  %v61_v50 = vmul.f32 0.03125, %v52_v47  ;;  %v74_v51 = vmul.f32 %v1759_v43, %v1759_v43  ;;  %v75_v52 = vmul.f32 %v1761_v44, %v1761_v44 }
  0x9e   :  { %1555 = vmatpush1.bf16.msra.mxu0 %v1554_v9  ;;  %1567 = vmatpush1.bf16.msra.mxu1 %v1554_v9  ;;  %v170_v9 = vrot.slane %v1735_v18, %v169_v7 }
  0x9f   :  { %v1769_v53 = vsub.f32 %v23_v12, %v60_v49  ;;  %v1771_v54 = vsub.f32 %v24_v13, %v61_v50  ;;  %v90_v55 = vsel %vm28_vm0, %v74_v51, 0.0  ;;  %v93_v56 = vsel %vm28_vm0, %v75_v52, 0.0 }
  0xa0   :  { %88 = vadd.xlane.f32.xlu1 %v87_v48  ;;  %91 = vadd.xlane.f32.xlu0 %v90_v55 }
  0xa1   :  { %v76_v57 = vmul.f32 %v1769_v53, %v1769_v53  ;;  %v77_v58 = vmul.f32 %v1771_v54, %v1771_v54 }
  0xa3   :  { %v96_v59 = vsel %vm28_vm0, %v76_v57, 0.0  ;;  %v99_v60 = vsel %vm28_vm0, %v77_v58, 0.0 }
  0xa4   :  { %94 = vadd.xlane.f32.xlu1 %v93_v56  ;;  %97 = vadd.xlane.f32.xlu0 %v96_v59 }
  0xa8   :  { %100 = vadd.xlane.f32.xlu1 %v99_v60 }
  0xba   :  { %147 = vrot.lane.b32.xlu0 %v1808_v8, %s1669_s24 }
 0x125   :  { %v80_v11 = vpop.xlane.xlu0 %79 }
 0x126   :  { %v102_v12 = vmul.f32 0.03125, %v80_v11 }
 0x128   :  { %v110_v13 = vadd.f32 1e-05, %v102_v12 }
 0x129   :  { %v83_v14 = vpop.xlane.xlu1 %82  ;;  %v86_v15 = vpop.xlane.xlu0 %85 }
 0x12a   :  { %1572 = vrsqrt.f32 %v110_v13  ;;  %v103_v16 = vmul.f32 0.03125, %v83_v14  ;;  %v104_v19 = vmul.f32 0.03125, %v86_v15 }
 0x12c   :  { %v111_v21 = vadd.f32 1e-05, %v103_v16  ;;  %v112_v22 = vadd.f32 1e-05, %v104_v19 }
 0x12d   :  { %v89_v23 = vpop.xlane.xlu1 %88  ;;  %v92_v24 = vpop.xlane.xlu0 %91 }
 0x12e   :  { %1574 = vrsqrt.f32 %v111_v21  ;;  %v105_v27 = vmul.f32 0.03125, %v89_v23  ;;  %v106_v28 = vmul.f32 0.03125, %v92_v24 }
 0x12f   :  { %1576 = vrsqrt.f32 %v112_v22 }
 0x130   :  { %v113_v29 = vadd.f32 1e-05, %v105_v27  ;;  %v114_v30 = vadd.f32 1e-05, %v106_v28 }
 0x131   :  { %v95_v31 = vpop.xlane.xlu1 %94  ;;  %v98_v32 = vpop.xlane.xlu0 %97 }
 0x132   :  { %1578 = vrsqrt.f32 %v113_v29  ;;  %v107_v35 = vmul.f32 0.03125, %v95_v31  ;;  %v108_v36 = vmul.f32 0.03125, %v98_v32 }
 0x133   :  { %1580 = vrsqrt.f32 %v114_v30 }
 0x134   :  { %v1573_v37 = vpop.eup %1572  ;;  %v115_v38 = vadd.f32 1e-05, %v107_v35  ;;  %v116_v39 = vadd.f32 1e-05, %v108_v36 }
 0x135   :  { %v101_v40 = vpop.xlane.xlu1 %100  ;;  %v126_v41 = vmul.f32 %v1573_v37, %v1741_v25  ;;  %v1815_v45 = vpop.permute.xlu0 %147 }
 0x136   :  { %v109_v42 = vmul.f32 0.03125, %v101_v40  ;;  %2555 = vst [vmem:[#allocation2_spill] sm:$0xff] %v1815_v45  ;;  %1582 = vrsqrt.f32 %v116_v39 }
 0x137   :  { %v138_v46 = vmul.f32 %v1808_v8, %v126_v41  ;;  %1584 = vrsqrt.f32 %v115_v38 }
 0x138   :  { %v1575_v47 = vpop.eup %1574  ;;  %v117_v48 = vadd.f32 1e-05, %v109_v42 }
 0x139   :  { %v1577_v49 = vpop.eup %1576  ;;  %v150_v50 = vadd.f32 %v1815_v45, %v138_v46  ;;  %v127_v51 = vmul.f32 %v1575_v47, %v1749_v33 }
 0x13a   :  { %1586 = vrsqrt.f32 %v117_v48  ;;  %v128_v52 = vmul.f32 %v1577_v49, %v1743_v26 }
 0x13b   :  { %1483 = vmatmul.mubr.msk.f32.vlgmr.msra.gmra.mrb[0].mxu0 %vm28_vm0, %v150_v50  ;;  %v139_v25 = vmul.f32 %v1808_v8, %v127_v51 }
 0x13c   :  { %v1579_v55 = vpop.eup %1578  ;;  %271 = vmatprep.mubr.f32.mxu0 %v1670_v10  ;;  %v140_v57 = vmul.f32 %v1808_v8, %v128_v52 }
 0x13d   :  { %v151_v56 = vadd.f32 %v1815_v45, %v139_v25  ;;  %v129_v58 = vmul.f32 %v1579_v55, %v1751_v34  ;;  %v1581_v59 = vpop.eup %1580 }
 0x13e   :  { %v152_v26 = vadd.f32 %v1815_v45, %v140_v57  ;;  %v130_v61 = vmul.f32 %v1581_v59, %v1759_v43 }
 0x13f   :  { %1484 = vmatmul.mubr.msk.f32.gmra.mrb[2].mxu0 %vm28_vm0, %v151_v56  ;;  %v141_v60 = vmul.f32 %v1808_v8, %v129_v58 }
 0x140   :  { %277 = vmatprep.mubr.f32.mxu0 %v1670_v10  ;;  %v1583_v33 = vpop.eup %1582  ;;  %v142_v2 = vmul.f32 %v1808_v8, %v130_v61 }
 0x141   :  { %v1585_v62 = vpop.eup %1584  ;;  %v132_v63 = vmul.f32 %v1583_v33, %v1769_v53  ;;  %v153_v1 = vadd.f32 %v1815_v45, %v141_v60 }
 0x142   :  { %v131_v4 = vmul.f32 %v1585_v62, %v1761_v44  ;;  %v154_v5 = vadd.f32 %v1815_v45, %v142_v2 }
 0x143   :  { %1485 = vmatmul.mubr.msk.f32.gmra.mrb[4].mxu0 %vm28_vm0, %v152_v26  ;;  %v144_v34 = vmul.f32 %v1808_v8, %v132_v63 }
 0x144   :  { %v1587_v0 = vpop.eup %1586  ;;  %283 = vmatprep.mubr.f32.mxu0 %v1670_v10 }
 0x145   :  { %v133_v3 = vmul.f32 %v1587_v0, %v1771_v54  ;;  %v156_v43 = vadd.f32 %v1815_v45, %v144_v34  ;;  %v143_v54 = vmul.f32 %v1808_v8, %v131_v4 }
 0x147   :  { %1486 = vmatmul.mubr.msk.f32.gmra.mrb[6].mxu0 %vm28_vm0, %v153_v1  ;;  %v145_v53 = vmul.f32 %v1808_v8, %v133_v3  ;;  %1489 = vmatmul.mubr.msk.f32.vlgmr.msra.gmra.mrb[0].mxu1 %vm28_vm0, %v156_v43  ;;  %v155_v44 = vadd.f32 %v1815_v45, %v143_v54 }
 0x148   :  { %289 = vmatprep.mubr.f32.mxu0 %v1670_v10  ;;  %307 = vmatprep.mubr.f32.mxu1 %v1670_v10 }
 0x149   :  { %v157_v6 = vadd.f32 %v1815_v45, %v145_v53 }
 0x14b   :  { %1487 = vmatmul.mubr.msk.f32.gmra.mrb[8].mxu0 %vm28_vm0, %v154_v5  ;;  %1490 = vmatmul.mubr.msk.f32.gmra.mrb[2].mxu1 %vm28_vm0, %v157_v6 }
 0x14c   :  { %295 = vmatprep.mubr.f32.mxu0 %v1670_v10 }
 0x14f   :  { %1488 = vmatmul.mubr.msk.f32.gmra.mrb[10].mxu0 %vm28_vm0, %v155_v44 }
 0x20e   :  { %v267_v11 = vpop.f32.mrb[0].mxu0 }
 0x20f   :  { %v1856_v12 = vadd.f32 %v267_v11, %v170_v9  ;;  %v269_v13 = vpop.f32.mrb[1].mxu0 }
 0x210   :  { %v1859_v8 = vadd.f32 %v269_v13, %v1739_v20 }
 0x211   :  { %v1491_v14 = vmul.f32 -1.442695, %v1856_v12 }
 0x212   :  { %2556 = vst [vmem:[#allocation3_spill] sm:$0xff] %v1859_v8  ;;  %v273_v15 = vpop.f32.mrb[2].mxu0 }
 0x213   :  { %1588 = vpow2.f32 %v1491_v14  ;;  %v1862_v10 = vadd.f32 %v273_v15, %v170_v9  ;;  %v275_v16 = vpop.f32.mrb[3].mxu0 }
 0x214   :  { %v1865_v19 = vadd.f32 %v275_v16, %v1739_v20 }
 0x215   :  { %v1493_v17 = vmul.f32 -1.442695, %v1862_v10 }
 0x216   :  { %2557 = vst [vmem:[#allocation4_spill] sm:$0xff] %v1865_v19  ;;  %v279_v18 = vpop.f32.mrb[4].mxu0 }
 0x217   :  { %1590 = vpow2.f32 %v1493_v17  ;;  %v1868_v21 = vadd.f32 %v279_v18, %v170_v9  ;;  %v281_v22 = vpop.f32.mrb[5].mxu0 }
 0x218   :  { %v1871_v23 = vadd.f32 %v281_v22, %v1739_v20 }
 0x219   :  { %v1495_v24 = vmul.f32 -1.442695, %v1868_v21 }
 0x21a   :  { %2558 = vst [vmem:[#allocation5_spill] sm:$0xff] %v1871_v23  ;;  %v285_v27 = vpop.f32.mrb[6].mxu0  ;;  %v303_v29 = vpop.f32.mrb[0].mxu1 }
 0x21b   :  { %1592 = vpow2.f32 %v1495_v24  ;;  %v1874_v28 = vadd.f32 %v285_v27, %v170_v9  ;;  %v287_v30 = vpop.f32.mrb[7].mxu0  ;;  %v305_v32 = vpop.f32.mrb[1].mxu1  ;;  %v1883_v39 = vadd.f32 %v303_v29, %v170_v9 }
 0x21c   :  { %v1877_v31 = vadd.f32 %v287_v30, %v1739_v20  ;;  %v1881_v37 = vadd.f32 %v305_v32, %v1739_v20 }
 0x21d   :  { %v1589_v35 = vpop.eup %1588  ;;  %v1497_v36 = vmul.f32 -1.442695, %v1874_v28  ;;  %v1503_v52 = vmul.f32 -1.442695, %v1883_v39 }
 0x21e   :  { %2559 = vst [vmem:[#allocation6_spill] sm:$0xff] %v1877_v31  ;;  %2560 = vst [vmem:[#allocation7_spill] sm:$0xff] %v1881_v37  ;;  %v362_v38 = vadd.f32 1.0, %v1589_v35  ;;  %v291_v40 = vpop.f32.mrb[8].mxu0  ;;  %v309_v42 = vpop.f32.mrb[2].mxu1 }
 0x21f   :  { %1594 = vpow2.f32 %v1497_v36  ;;  %v1885_v41 = vadd.f32 %v291_v40, %v170_v9  ;;  %v293_v46 = vpop.f32.mrb[9].mxu0  ;;  %v311_v48 = vpop.f32.mrb[3].mxu1  ;;  %v1898_v59 = vadd.f32 %v309_v42, %v170_v9 }
 0x220   :  { %1596 = vrcp.f32 %v362_v38  ;;  %v1888_v47 = vadd.f32 %v293_v46, %v1739_v20  ;;  %v1891_v50 = vadd.f32 %v311_v48, %v1739_v20 }
 0x221   :  { %v1591_v49 = vpop.eup %1590  ;;  %v1499_v55 = vmul.f32 -1.442695, %v1885_v41  ;;  %v1505_v61 = vmul.f32 -1.442695, %v1898_v59 }
 0x222   :  { %2561 = vst [vmem:[#allocation8_spill] sm:$0xff] %v1888_v47  ;;  %2562 = vst [vmem:[#allocation9_spill] sm:$0xff] %v1891_v50  ;;  %v364_v51 = vadd.f32 1.0, %v1591_v49  ;;  %v297_v25 = vpop.f32.mrb[10].mxu0 }
 0x223   :  { %v299_v56 = vpop.f32.mrb[11].mxu0  ;;  %v298_v26 = vadd.f32 %v297_v25, %v170_v9 }
 0x224   :  { %1598 = vrcp.f32 %v364_v51  ;;  %v1896_v57 = vadd.f32 %v299_v56, %v1739_v20 }
 0x225   :  { %v1593_v58 = vpop.eup %1592  ;;  %1600 = vpow2.f32 %v1503_v52  ;;  %v1501_v0 = vmul.f32 -1.442695, %v298_v26 }
 0x226   :  { %2563 = vst [vmem:[#allocation10_spill] sm:$0xff] %v1896_v57  ;;  %v366_v33 = vadd.f32 1.0, %v1593_v58  ;;  %1602 = vpow2.f32 %v1499_v55 }
 0x228   :  { %1604 = vrcp.f32 %v366_v33 }
 0x229   :  { %v1595_v60 = vpop.eup %1594 }
 0x22a   :  { %v1597_v62 = vpop.eup %1596  ;;  %v368_v63 = vadd.f32 1.0, %v1595_v60 }
 0x22b   :  { %418 = vrot.lane.b32.xlu1 %v1597_v62, %s1671_s1 }
 0x22c   :  { %1606 = vrcp.f32 %v368_v63 }
 0x22d   :  { %1608 = vpow2.f32 %v1505_v61 }
 0x22e   :  { %v1599_v20 = vpop.eup %1598  ;;  %1610 = vpow2.f32 %v1501_v0 }
 0x22f   :  { %420 = vrot.lane.b32.xlu1 %v1599_v20, %s1671_s1  ;;  %v1601_v34 = vpop.eup %1600 }
 0x230   :  { %v1603_v1 = vpop.eup %1602  ;;  %v374_v4 = vadd.f32 1.0, %v1601_v34 }
 0x231   :  { %v370_v3 = vadd.f32 1.0, %v1603_v1 }
 0x232   :  { %v1605_v2 = vpop.eup %1604 }
 0x233   :  { %422 = vrot.lane.b32.xlu1 %v1605_v2, %s1671_s1  ;;  %1612 = vrcp.f32 %v370_v3 }
 0x234   :  { %1614 = vrcp.f32 %v374_v4 }
 0x236   :  { %v1607_v43 = vpop.eup %1606 }
 0x237   :  { %v1609_v53 = vpop.eup %1608  ;;  %424 = vrot.lane.b32.xlu0 %v1607_v43, %s1671_s1 }
 0x238   :  { %v1611_v5 = vpop.eup %1610  ;;  %v376_v54 = vadd.f32 1.0, %v1609_v53 }
 0x239   :  { %v372_v6 = vadd.f32 1.0, %v1611_v5 }
 0x23b   :  { %1616 = vrcp.f32 %v372_v6 }
 0x23c   :  { %1618 = vrcp.f32 %v376_v54 }
 0x23d   :  { %v1613_v44 = vpop.eup %1612 }
 0x23e   :  { %426 = vrot.lane.b32.xlu1 %v1613_v44, %s1671_s1  ;;  %v1615_v7 = vpop.eup %1614 }
 0x242   :  { %430 = vrot.lane.b32.xlu1 %v1615_v7, %s1671_s1 }
 0x245   :  { %v1617_v9 = vpop.eup %1616 }
 0x246   :  { %428 = vrot.lane.b32.xlu0 %v1617_v9, %s1671_s1  ;;  %v1619_v11 = vpop.eup %1618 }
 0x24a   :  { %432 = vrot.lane.b32.xlu0 %v1619_v11, %s1671_s1 }
 0x29d   :  { %v419_v13 = vpop.permute.xlu1 %418 }
 0x29e   :  { %v1910_v14 = vmul.f32 %v419_v13, %v1856_v12 }
 0x2a0   :  { %451 = vrot.lane.b32.xlu1 %v1910_v14, %s1672_s25 }
 0x2a1   :  { %v421_v15 = vpop.permute.xlu1 %420 }
 0x2a2   :  { %v1914_v16 = vmul.f32 %v421_v15, %v1862_v10 }
 0x2a4   :  { %520 = vrot.lane.b32.xlu0 %v1914_v16, %s1672_s25 }
 0x2a5   :  { %v423_v17 = vpop.permute.xlu1 %422 }
 0x2a6   :  { %v1918_v18 = vmul.f32 %v423_v17, %v1868_v21 }
 0x2a8   :  { %588 = vrot.lane.b32.xlu1 %v1918_v18, %s1672_s25 }
 0x2a9   :  { %v425_v22 = vpop.permute.xlu0 %424 }
 0x2aa   :  { %v1922_v24 = vmul.f32 %v425_v22, %v1874_v28 }
 0x2ac   :  { %656 = vrot.lane.b32.xlu0 %v1922_v24, %s1672_s25 }
 0x2b0   :  { %v427_v12 = vpop.permute.xlu1 %426 }
 0x2b1   :  { %v1926_v27 = vmul.f32 %v427_v12, %v1885_v41 }
 0x2b3   :  { %724 = vrot.lane.b32.xlu1 %v1926_v27, %s1672_s25 }
 0x2b4   :  { %v431_v10 = vpop.permute.xlu1 %430 }
 0x2b5   :  { %v1930_v29 = vmul.f32 %v431_v10, %v1883_v39 }
 0x2b7   :  { %860 = vrot.lane.b32.xlu1 %v1930_v29, %s1672_s25 }
 0x2b8   :  { %v429_v21 = vpop.permute.xlu0 %428 }
 0x2b9   :  { %v1933_v30 = vmul.f32 %v429_v21, %v298_v26 }
 0x2bb   :  { %792 = vrot.lane.b32.xlu0 %v1933_v30, %s1672_s25 }
 0x2bc   :  { %v433_v28 = vpop.permute.xlu0 %432 }
 0x2bd   :  { %v1937_v32 = vmul.f32 %v433_v28, %v1898_v59 }
 0x2bf   :  { %928 = vrot.lane.b32.xlu0 %v1937_v32, %s1672_s25 }
 0x312   :  { %v452_v35 = vpop.permute.xlu1 %451 }
 0x313   :  { %v454_v36 = vmul.f32 %v452_v35, %v1910_v14  ;;  %v455_v38 = vmul.f32 %v452_v35, %v1914_v16  ;;  %v456_v39 = vmul.f32 %v452_v35, %v1918_v18  ;;  %v457_v40 = vmul.f32 %v452_v35, %v1922_v24 }
 0x314   :  { %v1945_v41 = vmul.f32 %v452_v35, %v1926_v27  ;;  %v1948_v42 = vmul.f32 %v452_v35, %v1933_v30  ;;  %v1951_v46 = vmul.f32 %v452_v35, %v1930_v29  ;;  %v1954_v48 = vmul.f32 %v452_v35, %v1937_v32 }
 0x315   :  { %v463_v49 = vsel %vm462_vm1, %v454_v36, 0.0  ;;  %v470_v51 = vsel %vm462_vm1, %v455_v38, 0.0  ;;  %v477_v52 = vsel %vm462_vm1, %v456_v39, 0.0  ;;  %v484_v25 = vsel %vm462_vm1, %v457_v40, 0.0 }
 0x316   :  { %v464_v55 = vrot.slane %v463_v49, 4  ;;  %v471_v56 = vrot.slane %v470_v51, 4  ;;  %v478_v58 = vrot.slane %v477_v52, 4  ;;  %v1960_v59 = vpop.permute.xlu0 %520  ;;  %v485_v33 = vrot.slane %v484_v25, 4 }
 0x317   :  { %v523_v26 = vmul.f32 %v1960_v59, %v1910_v14  ;;  %v524_v60 = vmul.f32 %v1960_v59, %v1914_v16  ;;  %v525_v61 = vmul.f32 %v1960_v59, %v1918_v18  ;;  %v1970_v62 = vmul.f32 %v1960_v59, %v1922_v24 }
 0x318   :  { %v465_v63 = vadd.f32 %v464_v55, %v463_v49  ;;  %v472_v0 = vadd.f32 %v471_v56, %v470_v51  ;;  %v1974_v20 = vmul.f32 %v1960_v59, %v1926_v27  ;;  %v479_v34 = vadd.f32 %v478_v58, %v477_v52 }
 0x319   :  { %v531_v1 = vsel %vm462_vm1, %v523_v26, 0.0  ;;  %v538_v2 = vsel %vm462_vm1, %v524_v60, 0.0  ;;  %v1979_v3 = vsel %vm462_vm1, %v525_v61, 0.0  ;;  %v486_v4 = vadd.f32 %v485_v33, %v484_v25 }
 0x31a   :  { %v532_v43 = vrot.slane %v531_v1, 4  ;;  %v539_v53 = vrot.slane %v538_v2, 4  ;;  %v1982_v6 = vpop.permute.xlu1 %588  ;;  %v466_v54 = vrot.slane %v465_v63, 2  ;;  %v473_v28 = vrot.slane %v472_v0, 2 }
 0x31b   :  { %v591_v44 = vmul.f32 %v1982_v6, %v1910_v14  ;;  %v592_v7 = vmul.f32 %v1982_v6, %v1914_v16  ;;  %v593_v9 = vmul.f32 %v1982_v6, %v1918_v18  ;;  %v1992_v11 = vmul.f32 %v1982_v6, %v1922_v24 }
 0x31c   :  { %v1994_v13 = vadd.f32 %v532_v43, %v531_v1  ;;  %v1996_v15 = vadd.f32 %v539_v53, %v538_v2  ;;  %v2000_v17 = vmul.f32 %v1982_v6, %v1926_v27  ;;  %v467_v22 = vadd.f32 %v466_v54, %v465_v63 }
 0x31d   :  { %v599_v12 = vsel %vm462_vm1, %v591_v44, 0.0  ;;  %v606_v10 = vsel %vm462_vm1, %v592_v7, 0.0  ;;  %v2005_v21 = vsel %vm462_vm1, %v593_v9, 0.0  ;;  %v474_v63 = vadd.f32 %v473_v28, %v472_v0 }
 0x31e   :  { %v600_v35 = vrot.slane %v599_v12, 4  ;;  %v607_v36 = vrot.slane %v606_v10, 4  ;;  %v2008_v39 = vpop.permute.xlu0 %656  ;;  %v468_v40 = vrot.slane %v467_v22, 1  ;;  %v480_v53 = vrot.slane %v479_v34, 2 }
 0x31f   :  { %v659_v49 = vmul.f32 %v2008_v39, %v1910_v14  ;;  %v660_v51 = vmul.f32 %v2008_v39, %v1914_v16  ;;  %v661_v52 = vmul.f32 %v2008_v39, %v1918_v18  ;;  %v2018_v25 = vmul.f32 %v2008_v39, %v1922_v24 }
 0x320   :  { %v2020_v55 = vadd.f32 %v600_v35, %v599_v12  ;;  %v2022_v56 = vadd.f32 %v607_v36, %v606_v10  ;;  %v2026_v58 = vmul.f32 %v2008_v39, %v1926_v27  ;;  %v2028_v33 = vadd.f32 %v468_v40, %v467_v22 }
 0x321   :  { %v667_v26 = vsel %vm462_vm1, %v659_v49, 0.0  ;;  %v674_v60 = vsel %vm462_vm1, %v660_v51, 0.0  ;;  %v2033_v61 = vsel %vm462_vm1, %v661_v52, 0.0  ;;  %v475_v54 = vrot.slane %v474_v63, 1 }
 0x322   :  { %v668_v1 = vrot.slane %v667_v26, 4  ;;  %v675_v2 = vrot.slane %v674_v60, 4  ;;  %v487_v44 = vrot.slane %v486_v4, 2  ;;  %v491_v7 = vsel %vm462_vm1, %v1945_v41, 0.0 }
 0x323   :  { %v498_v9 = vsel %vm462_vm1, %v1948_v42, 0.0  ;;  %v481_v10 = vadd.f32 %v480_v53, %v479_v34  ;;  %v492_v35 = vrot.slane %v491_v7, 4  ;;  %v2044_v0 = vadd.f32 %v475_v54, %v474_v63 }
 0x324   :  { %v2040_v22 = vadd.f32 %v668_v1, %v667_v26  ;;  %v2042_v12 = vadd.f32 %v675_v2, %v674_v60  ;;  %v488_v28 = vadd.f32 %v487_v44, %v486_v4  ;;  %v499_v36 = vrot.slane %v498_v9, 4 }
 0x325   :  { %v505_v40 = vsel %vm462_vm1, %v1951_v46, 0.0  ;;  %v2048_v49 = vpop.permute.xlu1 %724  ;;  %v482_v51 = vrot.slane %v481_v10, 1  ;;  %v493_v41 = vadd.f32 %v492_v35, %v491_v7  ;;  %v2052_v42 = vsel %vm462_vm1, %v1954_v48, 0.0 }
 0x326   :  { %v506_v52 = vrot.slane %v505_v40, 4  ;;  %v727_v34 = vmul.f32 %v2048_v49, %v1910_v14  ;;  %v728_v26 = vmul.f32 %v2048_v49, %v1914_v16  ;;  %v729_v4 = vmul.f32 %v2048_v49, %v1918_v18 }
 0x327   :  { %v2062_v46 = vmul.f32 %v2048_v49, %v1922_v24  ;;  %v2066_v60 = vmul.f32 %v2048_v49, %v1926_v27  ;;  %v483_v63 = vadd.f32 %v482_v51, %v481_v10  ;;  %v489_v48 = vrot.slane %v488_v28, 1 }
 0x328   :  { %v494_v1 = vrot.slane %v493_v41, 2  ;;  %v735_v2 = vsel %vm462_vm1, %v727_v34, 0.0  ;;  %v742_v53 = vsel %vm462_vm1, %v728_v26, 0.0  ;;  %v2071_v54 = vsel %vm462_vm1, %v729_v4, 0.0 }
 0x329   :  { %v500_v44 = vadd.f32 %v499_v36, %v498_v9  ;;  %v736_v7 = vrot.slane %v735_v2, 4  ;;  %v743_v35 = vrot.slane %v742_v53, 4  ;;  %v2074_v38 = vpop.permute.xlu1 %860  ;;  %v490_v5 = vadd.f32 %v489_v48, %v488_v28 }
 0x32a   :  { %2564 = vst [vmem:[#allocation11_spill] sm:$0xff] %v2074_v38  ;;  %v863_v10 = vmul.f32 %v2074_v38, %v1910_v14  ;;  %v864_v51 = vmul.f32 %v2074_v38, %v1914_v16  ;;  %v865_v34 = vmul.f32 %v2074_v38, %v1918_v18  ;;  %v2084_v9 = vmul.f32 %v2074_v38, %v1922_v24 }
 0x32b   :  { %v2086_v36 = vadd.f32 %v736_v7, %v735_v2  ;;  %v2088_v26 = vadd.f32 %v743_v35, %v742_v53  ;;  %v2092_v28 = vmul.f32 %v2074_v38, %v1926_v27  ;;  %v495_v4 = vadd.f32 %v494_v1, %v493_v41 }
 0x32c   :  { %2565 = vst [vmem:[#allocation12_spill] sm:$0xff] %v2084_v9  ;;  %v871_v43 = vsel %vm462_vm1, %v863_v10, 0.0  ;;  %v878_v37 = vsel %vm462_vm1, %v864_v51, 0.0  ;;  %v2099_v50 = vsel %vm462_vm1, %v865_v34, 0.0  ;;  %v501_v47 = vrot.slane %v500_v44, 2 }
 0x32d   :  { %2566 = vst [vmem:[#allocation13_spill] sm:$0xff] %v2092_v28  ;;  %v2094_v48 = vpop.permute.xlu0 %792  ;;  %2567 = vst [vmem:[#allocation14_spill] sm:$0xff] %v2099_v50  ;;  %v872_v35 = vrot.slane %v871_v43, 4  ;;  %v879_v10 = vrot.slane %v878_v37, 4  ;;  %v496_v23 = vrot.slane %v495_v4, 1  ;;  %v1004_v45 = vsel %vm1003_vm2, %v2044_v0, %v2028_v33 }
 0x32e   :  { %v795_v2 = vmul.f32 %v2094_v48, %v1910_v14  ;;  %v796_v53 = vmul.f32 %v2094_v48, %v1914_v16  ;;  %v797_v41 = vmul.f32 %v2094_v48, %v1918_v18  ;;  %v2109_v1 = vmul.f32 %v2094_v48, %v1922_v24 }
 0x32f   :  { %v2113_v7 = vmul.f32 %v2094_v48, %v1926_v27  ;;  %v2122_v28 = vadd.f32 %v872_v35, %v871_v43  ;;  %v2126_v38 = vadd.f32 %v879_v10, %v878_v37  ;;  %v497_v51 = vadd.f32 %v496_v23, %v495_v4 }
 0x330   :  { %v803_v34 = vsel %vm462_vm1, %v795_v2, 0.0  ;;  %v810_v57 = vsel %vm462_vm1, %v796_v53, 0.0  ;;  %v2119_v31 = vsel %vm462_vm1, %v797_v41, 0.0  ;;  %v502_v50 = vadd.f32 %v501_v47, %v500_v44 }
 0x331   :  { %2568 = vst [vmem:[#allocation15_spill] sm:$0xff] %v2113_v7  ;;  %v804_v8 = vrot.slane %v803_v34, 4  ;;  %v811_v19 = vrot.slane %v810_v57, 4  ;;  %2569 = vst [vmem:[#allocation16_spill] sm:$0xff] %v2122_v28  ;;  %v2124_v9 = vpop.permute.xlu0 %928  ;;  %v507_v2 = vadd.f32 %v506_v52, %v505_v40  ;;  %v513_v41 = vrot.slane %v2052_v42, 4 }
 0x332   :  { %v503_v43 = vrot.slane %v502_v50, 1  ;;  %v1006_v28 = vsel %vm1005_vm3, %v483_v63, %v1004_v45  ;;  %v931_v23 = vmul.f32 %v2124_v9, %v1910_v14  ;;  %v933_v47 = vmul.f32 %v2124_v9, %v1918_v18 }
 0x333   :  { %v2128_v7 = vadd.f32 %v804_v8, %v803_v34  ;;  %v2130_v53 = vadd.f32 %v811_v19, %v810_v57  ;;  %v508_v35 = vrot.slane %v507_v2, 2  ;;  %v514_v37 = vadd.f32 %v513_v41, %v2052_v42 }
 0x334   :  { %v1008_v8 = vsel %vm1007_vm4, %v490_v5, %v1006_v28  ;;  %v932_v19 = vmul.f32 %v2124_v9, %v1914_v16  ;;  %v504_v57 = vadd.f32 %v503_v43, %v502_v50  ;;  %v2148_v45 = vmul.f32 %v2124_v9, %v1922_v24 }
 0x335   :  { %v509_v33 = vadd.f32 %v508_v35, %v507_v2  ;;  %v1010_v0 = vsel %vm1009_vm5, %v497_v51, %v1008_v8  ;;  %v515_v40 = vrot.slane %v514_v37, 2  ;;  %v2152_v14 = vmul.f32 %v2124_v9, %v1926_v27 }
 0x336   :  { %v939_v5 = vsel %vm462_vm1, %v931_v23, 0.0  ;;  %v946_v16 = vsel %vm462_vm1, %v932_v19, 0.0  ;;  %v1012_v18 = vsel %vm1011_vm6, %v504_v57, %v1010_v0  ;;  %v2158_v44 = vsel %vm462_vm1, %v933_v47, 0.0 }
 0x337   :  { %v510_v52 = vrot.slane %v509_v33, 1  ;;  %v940_v50 = vrot.slane %v939_v5, 4  ;;  %v947_v42 = vrot.slane %v946_v16, 4  ;;  %v516_v63 = vadd.f32 %v515_v40, %v514_v37 }
 0x338   :  { %v528_v24 = vmul.f32 %v1960_v59, %v1933_v30  ;;  %v529_v27 = vmul.f32 %v1960_v59, %v1930_v29  ;;  %v954_v51 = vrot.slane %v2158_v44, 4  ;;  %v530_v2 = vmul.f32 %v1960_v59, %v1937_v32 }
 0x339   :  { %v511_v28 = vadd.f32 %v510_v52, %v509_v33  ;;  %v2164_v4 = vadd.f32 %v940_v50, %v939_v5  ;;  %v2166_v10 = vadd.f32 %v947_v42, %v946_v16  ;;  %v517_v34 = vrot.slane %v516_v63, 1 }
 0x33a   :  { %v534_v41 = vrot.slane %v1994_v13, 2  ;;  %v541_v43 = vrot.slane %v1996_v15, 2  ;;  %v2570_v23 = vrot.slane %v1979_v3, 4  ;;  %v552_v8 = vsel %vm462_vm1, %v1970_v62, 0.0 }
 0x33b   :  { %v1014_v35 = vsel %vm1013_vm7, %v511_v28, %v1012_v18  ;;  %v559_v19 = vsel %vm462_vm1, %v1974_v20, 0.0  ;;  %v518_v47 = vadd.f32 %v517_v34, %v516_v63  ;;  %v553_v33 = vrot.slane %v552_v8, 4 }
 0x33c   :  { %v547_v37 = vadd.f32 %v2570_v23, %v1979_v3  ;;  %v535_v57 = vadd.f32 %v534_v41, %v1994_v13  ;;  %v542_v59 = vadd.f32 %v541_v43, %v1996_v15  ;;  %v560_v40 = vrot.slane %v559_v19, 4 }
 0x33d   :  { %v566_v5 = vsel %vm462_vm1, %v528_v24, 0.0  ;;  %v573_v16 = vsel %vm462_vm1, %v529_v27, 0.0  ;;  %v2186_v3 = vsel %vm1015_vm8, %v518_v47, %v1014_v35  ;;  %v554_v18 = vadd.f32 %v553_v33, %v552_v8 }
 0x33e   :  { %v548_v0 = vrot.slane %v547_v37, 2  ;;  %v536_v52 = vrot.slane %v535_v57, 1  ;;  %v543_v62 = vrot.slane %v542_v59, 1  ;;  %1130 = vrot.lane.b32.xlu1 %v2186_v3, %s1669_s24  ;;  %v561_v13 = vadd.f32 %v560_v40, %v559_v19 }
 0x33f   :  { %v567_v50 = vrot.slane %v566_v5, 4  ;;  %v574_v15 = vrot.slane %v573_v16, 4  ;;  %v555_v28 = vrot.slane %v554_v18, 2  ;;  %v580_v24 = vsel %vm462_vm1, %v530_v2, 0.0 }
 0x340   :  { %v549_v20 = vadd.f32 %v548_v0, %v547_v37  ;;  %v537_v42 = vadd.f32 %v536_v52, %v535_v57  ;;  %v544_v63 = vadd.f32 %v543_v62, %v542_v59  ;;  %v562_v27 = vrot.slane %v561_v13, 2 }
 0x341   :  { %v568_v41 = vadd.f32 %v567_v50, %v566_v5  ;;  %v575_v43 = vadd.f32 %v574_v15, %v573_v16  ;;  %v556_v35 = vadd.f32 %v555_v28, %v554_v18  ;;  %v581_v23 = vrot.slane %v580_v24, 4 }
 0x342   :  { %v550_v34 = vrot.slane %v549_v20, 1  ;;  %v1026_v8 = vsel %vm1003_vm2, %v544_v63, %v537_v42  ;;  %v596_v47 = vmul.f32 %v1982_v6, %v1933_v30  ;;  %v563_v19 = vadd.f32 %v562_v27, %v561_v13 }
 0x343   :  { %v569_v33 = vrot.slane %v568_v41, 2  ;;  %v576_v0 = vrot.slane %v575_v43, 2  ;;  %v557_v57 = vrot.slane %v556_v35, 1  ;;  %v582_v59 = vadd.f32 %v581_v23, %v580_v24 }
 0x344   :  { %v551_v37 = vadd.f32 %v550_v34, %v549_v20  ;;  %v597_v2 = vmul.f32 %v1982_v6, %v1930_v29  ;;  %v598_v40 = vmul.f32 %v1982_v6, %v1937_v32  ;;  %v564_v5 = vrot.slane %v563_v19, 1 }
 0x345   :  { %v570_v16 = vadd.f32 %v569_v33, %v568_v41  ;;  %v577_v52 = vadd.f32 %v576_v0, %v575_v43  ;;  %v558_v18 = vadd.f32 %v557_v57, %v556_v35  ;;  %v583_v50 = vrot.slane %v582_v59, 2 }
 0x346   :  { %v1027_v62 = vsel %vm1005_vm3, %v551_v37, %v1026_v8  ;;  %v602_v20 = vrot.slane %v2020_v55, 2  ;;  %v609_v13 = vrot.slane %v2022_v56, 2  ;;  %v565_v15 = vadd.f32 %v564_v5, %v563_v19 }
 0x347   :  { %v571_v42 = vrot.slane %v570_v16, 1  ;;  %v578_v63 = vrot.slane %v577_v52, 1  ;;  %v2571_v28 = vrot.slane %v2005_v21, 4  ;;  %v584_v34 = vadd.f32 %v583_v50, %v582_v59 }
 0x348   :  { %v1028_v6 = vsel %vm1007_vm4, %v558_v18, %v1027_v62  ;;  %v603_v27 = vadd.f32 %v602_v20, %v2020_v55  ;;  %v610_v41 = vadd.f32 %v609_v13, %v2022_v56  ;;  %v620_v0 = vsel %vm462_vm1, %v1992_v11, 0.0 }
 0x349   :  { %v615_v24 = vadd.f32 %v2571_v28, %v2005_v21  ;;  %v572_v43 = vadd.f32 %v571_v42, %v570_v16  ;;  %v579_v35 = vadd.f32 %v578_v63, %v577_v52  ;;  %v1029_v23 = vsel %vm1009_vm5, %v565_v15, %v1028_v6 }
 0x34a   :  { %v585_v37 = vrot.slane %v584_v34, 1  ;;  %v604_v19 = vrot.slane %v603_v27, 1  ;;  %v611_v33 = vrot.slane %v610_v41, 1  ;;  %v621_v59 = vrot.slane %v620_v0, 4 }
 0x34b   :  { %v616_v8 = vrot.slane %v615_v24, 2  ;;  %v1030_v21 = vsel %vm1011_vm6, %v572_v43, %v1029_v23  ;;  %v627_v55 = vsel %vm462_vm1, %v2000_v17, 0.0  ;;  %v634_v20 = vsel %vm462_vm1, %v596_v47, 0.0 }
 0x34c   :  { %v586_v5 = vadd.f32 %v585_v37, %v584_v34  ;;  %v1031_v56 = vsel %vm1013_vm7, %v579_v35, %v1030_v21  ;;  %v605_v16 = vadd.f32 %v604_v19, %v603_v27  ;;  %v612_v52 = vadd.f32 %v611_v33, %v610_v41 }
 0x34d   :  { %v617_v57 = vadd.f32 %v616_v8, %v615_v24  ;;  %v622_v18 = vadd.f32 %v621_v59, %v620_v0  ;;  %v628_v50 = vrot.slane %v627_v55, 4  ;;  %v635_v11 = vrot.slane %v634_v20, 4 }
 0x34e   :  { %v2216_v13 = vsel %vm1015_vm8, %v586_v5, %v1031_v56  ;;  %v641_v15 = vsel %vm462_vm1, %v597_v2, 0.0  ;;  %v648_v42 = vsel %vm462_vm1, %v598_v40, 0.0  ;;  %v1042_v27 = vsel %vm1003_vm2, %v612_v52, %v605_v16 }
 0x34f   :  { %v618_v62 = vrot.slane %v617_v57, 1  ;;  %1132 = vrot.lane.b32.xlu0 %v2216_v13, %s1669_s24  ;;  %v623_v63 = vrot.slane %v622_v18, 2  ;;  %v629_v28 = vadd.f32 %v628_v50, %v627_v55  ;;  %v642_v24 = vrot.slane %v641_v15, 4 }
 0x350   :  { %v636_v34 = vadd.f32 %v635_v11, %v634_v20  ;;  %v649_v6 = vrot.slane %v648_v42, 4  ;;  %v664_v47 = vmul.f32 %v2008_v39, %v1933_v30  ;;  %v665_v8 = vmul.f32 %v2008_v39, %v1930_v29 }
 0x351   :  { %v619_v17 = vadd.f32 %v618_v62, %v617_v57  ;;  %v624_v41 = vadd.f32 %v623_v63, %v622_v18  ;;  %v630_v43 = vrot.slane %v629_v28, 2  ;;  %v643_v35 = vadd.f32 %v642_v24, %v641_v15 }
 0x352   :  { %v637_v40 = vrot.slane %v636_v34, 2  ;;  %v650_v23 = vadd.f32 %v649_v6, %v648_v42  ;;  %v666_v37 = vmul.f32 %v2008_v39, %v1937_v32  ;;  %v670_v21 = vrot.slane %v2040_v22, 2 }
 0x353   :  { %v1043_v2 = vsel %vm1005_vm3, %v619_v17, %v1042_v27  ;;  %v625_v19 = vrot.slane %v624_v41, 1  ;;  %v631_v33 = vadd.f32 %v630_v43, %v629_v28  ;;  %v644_v0 = vrot.slane %v643_v35, 2 }
 0x354   :  { %v638_v57 = vadd.f32 %v637_v40, %v636_v34  ;;  %v651_v59 = vrot.slane %v650_v23, 2  ;;  %v677_v55 = vrot.slane %v2042_v12, 2  ;;  %v2572_v5 = vrot.slane %v2033_v61, 4 }
 0x355   :  { %v626_v16 = vadd.f32 %v625_v19, %v624_v41  ;;  %v632_v52 = vrot.slane %v631_v33, 1  ;;  %v645_v62 = vadd.f32 %v644_v0, %v643_v35  ;;  %v671_v18 = vadd.f32 %v670_v21, %v2040_v22 }
 0x356   :  { %v683_v56 = vadd.f32 %v2572_v5, %v2033_v61  ;;  %v639_v50 = vrot.slane %v638_v57, 1  ;;  %v652_v39 = vadd.f32 %v651_v59, %v650_v23  ;;  %v678_v20 = vadd.f32 %v677_v55, %v2042_v12 }
 0x357   :  { %v633_v15 = vadd.f32 %v632_v52, %v631_v33  ;;  %v646_v42 = vrot.slane %v645_v62, 1  ;;  %v1044_v17 = vsel %vm1007_vm4, %v626_v16, %v1043_v2  ;;  %v672_v63 = vrot.slane %v671_v18, 1 }
 0x358   :  { %v684_v11 = vrot.slane %v683_v56, 2  ;;  %v640_v28 = vadd.f32 %v639_v50, %v638_v57  ;;  %v653_v24 = vrot.slane %v652_v39, 1  ;;  %v679_v34 = vrot.slane %v678_v20, 1 }
 0x359   :  { %v647_v61 = vadd.f32 %v646_v42, %v645_v62  ;;  %v1045_v27 = vsel %vm1009_vm5, %v633_v15, %v1044_v17  ;;  %v673_v41 = vadd.f32 %v672_v63, %v671_v18  ;;  %v688_v22 = vsel %vm462_vm1, %v2018_v25, 0.0 }
 0x35a   :  { %v685_v6 = vadd.f32 %v684_v11, %v683_v56  ;;  %v654_v43 = vadd.f32 %v653_v24, %v652_v39  ;;  %v1046_v12 = vsel %vm1011_vm6, %v640_v28, %v1045_v27  ;;  %v680_v35 = vadd.f32 %v679_v34, %v678_v20 }
 0x35b   :  { %v1047_v23 = vsel %vm1013_vm7, %v647_v61, %v1046_v12  ;;  %v689_v2 = vrot.slane %v688_v22, 4  ;;  %v695_v19 = vsel %vm462_vm1, %v2026_v58, 0.0  ;;  %v702_v33 = vsel %vm462_vm1, %v664_v47, 0.0 }
 0x35c   :  { %v686_v40 = vrot.slane %v685_v6, 1  ;;  %v2247_v0 = vsel %vm1015_vm8, %v654_v43, %v1047_v23  ;;  %v696_v57 = vrot.slane %v695_v19, 4  ;;  %v703_v59 = vrot.slane %v702_v33, 4 }
 0x35d   :  { %1134 = vrot.lane.b32.xlu1 %v2247_v0, %s1669_s24  ;;  %v690_v25 = vadd.f32 %v689_v2, %v688_v22  ;;  %v709_v55 = vsel %vm462_vm1, %v665_v8, 0.0  ;;  %v716_v5 = vsel %vm462_vm1, %v666_v37, 0.0  ;;  %v1058_v56 = vsel %vm1003_vm2, %v680_v35, %v673_v41 }
 0x35e   :  { %v687_v21 = vadd.f32 %v686_v40, %v685_v6  ;;  %v697_v16 = vadd.f32 %v696_v57, %v695_v19  ;;  %v704_v58 = vadd.f32 %v703_v59, %v702_v33  ;;  %v710_v52 = vrot.slane %v709_v55, 4 }
 0x35f   :  { %v717_v47 = vrot.slane %v716_v5, 4  ;;  %v691_v62 = vrot.slane %v690_v25, 2  ;;  %v732_v50 = vmul.f32 %v2048_v49, %v1933_v30  ;;  %v733_v39 = vmul.f32 %v2048_v49, %v1930_v29 }
 0x360   :  { %v1059_v18 = vsel %vm1005_vm3, %v687_v21, %v1058_v56  ;;  %v698_v20 = vrot.slane %v697_v16, 2  ;;  %v705_v11 = vrot.slane %v704_v58, 2  ;;  %v711_v8 = vadd.f32 %v710_v52, %v709_v55 }
 0x361   :  { %v718_v15 = vadd.f32 %v717_v47, %v716_v5  ;;  %v692_v37 = vadd.f32 %v691_v62, %v690_v25  ;;  %v734_v42 = vmul.f32 %v2048_v49, %v1937_v32  ;;  %v738_v17 = vrot.slane %v2086_v36, 2 }
 0x362   :  { %v745_v63 = vrot.slane %v2088_v26, 2  ;;  %v699_v28 = vadd.f32 %v698_v20, %v697_v16  ;;  %v706_v24 = vadd.f32 %v705_v11, %v704_v58  ;;  %v712_v34 = vrot.slane %v711_v8, 2 }
 0x363   :  { %v719_v6 = vrot.slane %v718_v15, 2  ;;  %v693_v61 = vrot.slane %v692_v37, 1  ;;  %v739_v27 = vadd.f32 %v738_v17, %v2086_v36  ;;  %v2573_v22 = vrot.slane %v2071_v54, 4 }
 0x364   :  { %v746_v41 = vadd.f32 %v745_v63, %v2088_v26  ;;  %v700_v12 = vrot.slane %v699_v28, 1  ;;  %v707_v35 = vrot.slane %v706_v24, 1  ;;  %v713_v49 = vadd.f32 %v712_v34, %v711_v8 }
 0x365   :  { %v751_v43 = vadd.f32 %v2573_v22, %v2071_v54  ;;  %v720_v40 = vadd.f32 %v719_v6, %v718_v15  ;;  %v694_v23 = vadd.f32 %v693_v61, %v692_v37  ;;  %v740_v2 = vrot.slane %v739_v27, 1 }
 0x366   :  { %v747_v19 = vrot.slane %v746_v41, 1  ;;  %v701_v21 = vadd.f32 %v700_v12, %v699_v28  ;;  %v708_v57 = vadd.f32 %v707_v35, %v706_v24  ;;  %v714_v59 = vrot.slane %v713_v49, 1 }
 0x367   :  { %v752_v33 = vrot.slane %v751_v43, 2  ;;  %v721_v25 = vrot.slane %v720_v40, 1  ;;  %v1060_v36 = vsel %vm1007_vm4, %v694_v23, %v1059_v18  ;;  %v741_v55 = vadd.f32 %v740_v2, %v739_v27 }
 0x368   :  { %v748_v26 = vadd.f32 %v747_v19, %v746_v41  ;;  %v715_v56 = vadd.f32 %v714_v59, %v713_v49  ;;  %v1061_v54 = vsel %vm1009_vm5, %v701_v21, %v1060_v36  ;;  %v756_v58 = vsel %vm462_vm1, %v2062_v46, 0.0 }
 0x369   :  { %v753_v5 = vadd.f32 %v752_v33, %v751_v43  ;;  %v722_v16 = vadd.f32 %v721_v25, %v720_v40  ;;  %v1062_v52 = vsel %vm1011_vm6, %v708_v57, %v1061_v54  ;;  %v757_v62 = vrot.slane %v756_v58, 4 }
 0x36a   :  { %v763_v20 = vsel %vm462_vm1, %v2066_v60, 0.0  ;;  %v1063_v11 = vsel %vm1013_vm7, %v715_v56, %v1062_v52  ;;  %v770_v8 = vsel %vm462_vm1, %v732_v50, 0.0  ;;  %v777_v15 = vsel %vm462_vm1, %v733_v39, 0.0 }
 0x36b   :  { %v754_v47 = vrot.slane %v753_v5, 1  ;;  %v764_v18 = vrot.slane %v763_v20, 4  ;;  %v2279_v37 = vsel %vm1015_vm8, %v722_v16, %v1063_v11  ;;  %v758_v63 = vadd.f32 %v757_v62, %v756_v58 }
 0x36c   :  { %v771_v46 = vrot.slane %v770_v8, 4  ;;  %1136 = vrot.lane.b32.xlu0 %v2279_v37, %s1669_s24  ;;  %v778_v24 = vrot.slane %v777_v15, 4  ;;  %v784_v60 = vsel %vm462_vm1, %v734_v42, 0.0  ;;  %v1074_v34 = vsel %vm1003_vm2, %v748_v26, %v741_v55 }
 0x36d   :  { %v755_v17 = vadd.f32 %v754_v47, %v753_v5  ;;  %v765_v28 = vadd.f32 %v764_v18, %v763_v20  ;;  %v759_v6 = vrot.slane %v758_v63, 2  ;;  %v785_v50 = vrot.slane %v784_v60, 4 }
 0x36e   :  { %v772_v61 = vadd.f32 %v771_v46, %v770_v8  ;;  %v779_v41 = vadd.f32 %v778_v24, %v777_v15  ;;  %v800_v22 = vmul.f32 %v2094_v48, %v1933_v30  ;;  %v801_v43 = vmul.f32 %v2094_v48, %v1930_v29 }
 0x36f   :  { %v1075_v39 = vsel %vm1005_vm3, %v755_v17, %v1074_v34  ;;  %v766_v27 = vrot.slane %v765_v28, 2  ;;  %v760_v12 = vadd.f32 %v759_v6, %v758_v63  ;;  %v786_v49 = vadd.f32 %v785_v50, %v784_v60  ;;  %v2575_v34 = vld [vmem:[#allocation15_spill] sm:$0xff] }
 0x370   :  { %v773_v35 = vrot.slane %v772_v61, 2  ;;  %v802_v42 = vmul.f32 %v2094_v48, %v1937_v32  ;;  %v780_v23 = vrot.slane %v779_v41, 2  ;;  %v806_v2 = vrot.slane %v2128_v7, 2 }
 0x371   :  { %v767_v40 = vadd.f32 %v766_v27, %v765_v28  ;;  %v813_v19 = vrot.slane %v2130_v53, 2  ;;  %v761_v33 = vrot.slane %v760_v12, 1  ;;  %v787_v57 = vrot.slane %v786_v49, 2 }
 0x372   :  { %v774_v21 = vadd.f32 %v773_v35, %v772_v61  ;;  %v2574_v59 = vrot.slane %v2119_v31, 4  ;;  %v781_v55 = vadd.f32 %v780_v23, %v779_v41  ;;  %v807_v26 = vadd.f32 %v806_v2, %v2128_v7 }
 0x373   :  { %v768_v36 = vrot.slane %v767_v40, 1  ;;  %v814_v5 = vadd.f32 %v813_v19, %v2130_v53  ;;  %v762_v48 = vadd.f32 %v761_v33, %v760_v12  ;;  %v788_v16 = vadd.f32 %v787_v57, %v786_v49 }
 0x374   :  { %v819_v25 = vadd.f32 %v2574_v59, %v2119_v31  ;;  %v775_v56 = vrot.slane %v774_v21, 1  ;;  %v782_v52 = vrot.slane %v781_v55, 1  ;;  %v808_v47 = vrot.slane %v807_v26, 1 }
 0x375   :  { %v769_v58 = vadd.f32 %v768_v36, %v767_v40  ;;  %v815_v62 = vrot.slane %v814_v5, 1  ;;  %v789_v11 = vrot.slane %v788_v16, 1  ;;  %v1076_v18 = vsel %vm1007_vm4, %v762_v48, %v1075_v39 }
 0x376   :  { %v820_v54 = vrot.slane %v819_v25, 2  ;;  %v776_v20 = vadd.f32 %v775_v56, %v774_v21  ;;  %v783_v31 = vadd.f32 %v782_v52, %v781_v55  ;;  %v809_v17 = vadd.f32 %v808_v47, %v807_v26  ;;  %v2576_v21 = vld [vmem:[#allocation11_spill] sm:$0xff] }
 0x377   :  { %v1077_v15 = vsel %vm1009_vm5, %v769_v58, %v1076_v18  ;;  %v816_v7 = vadd.f32 %v815_v62, %v814_v5  ;;  %v790_v63 = vadd.f32 %v789_v11, %v788_v16  ;;  %v824_v28 = vsel %vm462_vm1, %v2109_v1, 0.0  ;;  %v2577_v5 = vld [vmem:[#allocation16_spill] sm:$0xff]  ;;  %v2578_v11 = vld [vmem:[#allocation14_spill] sm:$0xff] }
 0x378   :  { %v821_v8 = vadd.f32 %v820_v54, %v819_v25  ;;  %v1078_v53 = vsel %vm1011_vm6, %v776_v20, %v1077_v15  ;;  %v825_v60 = vrot.slane %v824_v28, 4  ;;  %v831_v6 = vsel %vm462_vm1, %v2575_v34, 0.0 }
 0x379   :  { %v1079_v24 = vsel %vm1013_vm7, %v783_v31, %v1078_v53  ;;  %v838_v61 = vsel %vm462_vm1, %v800_v22, 0.0  ;;  %v832_v27 = vrot.slane %v831_v6, 4  ;;  %v845_v1 = vsel %vm462_vm1, %v801_v43, 0.0 }
 0x37a   :  { %v822_v46 = vrot.slane %v821_v8, 1  ;;  %v2309_v50 = vsel %vm1015_vm8, %v790_v63, %v1079_v24  ;;  %v839_v41 = vrot.slane %v838_v61, 4  ;;  %v826_v12 = vadd.f32 %v825_v60, %v824_v28 }
 0x37b   :  { %1138 = vrot.lane.b32.xlu1 %v2309_v50, %s1669_s24  ;;  %v852_v35 = vsel %vm462_vm1, %v802_v42, 0.0  ;;  %v1090_v49 = vsel %vm1003_vm2, %v816_v7, %v809_v17  ;;  %v833_v40 = vadd.f32 %v832_v27, %v831_v6  ;;  %v846_v2 = vrot.slane %v845_v1, 4 }
 0x37c   :  { %v823_v39 = vadd.f32 %v822_v46, %v821_v8  ;;  %v840_v23 = vadd.f32 %v839_v41, %v838_v61  ;;  %v853_v22 = vrot.slane %v852_v35, 4  ;;  %v827_v19 = vrot.slane %v826_v12, 2 }
 0x37d   :  { %v868_v57 = vmul.f32 %v2576_v21, %v1933_v30  ;;  %v869_v59 = vmul.f32 %v2576_v21, %v1930_v29  ;;  %v834_v25 = vrot.slane %v833_v40, 2  ;;  %v847_v43 = vadd.f32 %v846_v2, %v845_v1 }
 0x37e   :  { %v1091_v33 = vsel %vm1005_vm3, %v823_v39, %v1090_v49  ;;  %v841_v36 = vrot.slane %v840_v23, 2  ;;  %v854_v55 = vadd.f32 %v853_v22, %v852_v35  ;;  %v828_v42 = vadd.f32 %v827_v19, %v826_v12  ;;  %v2580_v35 = vld [vmem:[#allocation12_spill] sm:$0xff]  ;;  %v2581_v22 = vld [vmem:[#allocation13_spill] sm:$0xff] }
 0x37f   :  { %v870_v26 = vmul.f32 %v2576_v21, %v1937_v32  ;;  %v874_v48 = vrot.slane %v2577_v5, 2  ;;  %v881_v56 = vrot.slane %v2126_v38, 2  ;;  %v835_v16 = vadd.f32 %v834_v25, %v833_v40 }
 0x380   :  { %v842_v54 = vadd.f32 %v841_v36, %v840_v23  ;;  %v848_v58 = vrot.slane %v847_v43, 2  ;;  %v855_v52 = vrot.slane %v854_v55, 2  ;;  %v829_v47 = vrot.slane %v828_v42, 1 }
 0x381   :  { %v875_v62 = vadd.f32 %v874_v48, %v2577_v5  ;;  %v882_v20 = vadd.f32 %v881_v56, %v2126_v38  ;;  %v2579_v18 = vrot.slane %v2578_v11, 4  ;;  %v836_v31 = vrot.slane %v835_v16, 1 }
 0x382   :  { %v843_v15 = vrot.slane %v842_v54, 1  ;;  %v849_v17 = vadd.f32 %v848_v58, %v847_v43  ;;  %v856_v7 = vadd.f32 %v855_v52, %v854_v55  ;;  %v830_v63 = vadd.f32 %v829_v47, %v828_v42 }
 0x383   :  { %v887_v8 = vadd.f32 %v2579_v18, %v2578_v11  ;;  %v876_v53 = vrot.slane %v875_v62, 1  ;;  %v883_v46 = vrot.slane %v882_v20, 1  ;;  %v837_v24 = vadd.f32 %v836_v31, %v835_v16 }
 0x384   :  { %v844_v60 = vadd.f32 %v843_v15, %v842_v54  ;;  %v850_v34 = vrot.slane %v849_v17, 1  ;;  %v857_v6 = vrot.slane %v856_v7, 1  ;;  %v1092_v61 = vsel %vm1007_vm4, %v830_v63, %v1091_v33 }
 0x385   :  { %v888_v28 = vrot.slane %v887_v8, 2  ;;  %v877_v39 = vadd.f32 %v876_v53, %v875_v62  ;;  %v884_v38 = vadd.f32 %v883_v46, %v882_v20  ;;  %v1093_v1 = vsel %vm1009_vm5, %v837_v24, %v1092_v61 }
 0x386   :  { %v851_v41 = vadd.f32 %v850_v34, %v849_v17  ;;  %v858_v12 = vadd.f32 %v857_v6, %v856_v7  ;;  %v892_v49 = vsel %vm462_vm1, %v2580_v35, 0.0  ;;  %v1094_v40 = vsel %vm1011_vm6, %v844_v60, %v1093_v1 }
 0x387   :  { %v889_v27 = vadd.f32 %v888_v28, %v887_v8  ;;  %v893_v2 = vrot.slane %v892_v49, 4  ;;  %v899_v19 = vsel %vm462_vm1, %v2581_v22, 0.0  ;;  %v906_v25 = vsel %vm462_vm1, %v868_v57, 0.0 }
 0x388   :  { %v1095_v21 = vsel %vm1013_vm7, %v851_v41, %v1094_v40  ;;  %v900_v33 = vrot.slane %v899_v19, 4  ;;  %v913_v36 = vsel %vm462_vm1, %v869_v59, 0.0  ;;  %v907_v5 = vrot.slane %v906_v25, 4 }
 0x389   :  { %v890_v23 = vrot.slane %v889_v27, 1  ;;  %v2341_v43 = vsel %vm1015_vm8, %v858_v12, %v1095_v21  ;;  %v894_v42 = vadd.f32 %v893_v2, %v892_v49  ;;  %v914_v56 = vrot.slane %v913_v36, 4 }
 0x38a   :  { %1140 = vrot.lane.b32.xlu0 %v2341_v43, %s1669_s24  ;;  %v901_v48 = vadd.f32 %v900_v33, %v899_v19  ;;  %v920_v16 = vsel %vm462_vm1, %v870_v26, 0.0  ;;  %v1106_v54 = vsel %vm1003_vm2, %v884_v38, %v877_v39  ;;  %v908_v52 = vadd.f32 %v907_v5, %v906_v25 }
 0x38b   :  { %v891_v55 = vadd.f32 %v890_v23, %v889_v27  ;;  %v895_v58 = vrot.slane %v894_v42, 2  ;;  %v921_v57 = vrot.slane %v920_v16, 4  ;;  %v915_v62 = vadd.f32 %v914_v56, %v913_v36 }
 0x38c   :  { %v902_v47 = vrot.slane %v901_v48, 2  ;;  %v936_v20 = vmul.f32 %v2124_v9, %v1933_v30  ;;  %v937_v11 = vmul.f32 %v2124_v9, %v1930_v29  ;;  %v909_v8 = vrot.slane %v908_v52, 2 }
 0x38d   :  { %v1107_v59 = vsel %vm1005_vm3, %v891_v55, %v1106_v54  ;;  %v896_v18 = vadd.f32 %v895_v58, %v894_v42  ;;  %v922_v31 = vadd.f32 %v921_v57, %v920_v16  ;;  %v938_v26 = vmul.f32 %v2124_v9, %v1937_v32 }
 0x38e   :  { %v903_v15 = vadd.f32 %v902_v47, %v901_v48  ;;  %v916_v17 = vrot.slane %v915_v62, 2  ;;  %v942_v7 = vrot.slane %v2164_v4, 2  ;;  %v949_v63 = vrot.slane %v2166_v10, 2 }
 0x38f   :  { %v897_v53 = vrot.slane %v896_v18, 1  ;;  %v910_v46 = vadd.f32 %v909_v8, %v908_v52  ;;  %v923_v28 = vrot.slane %v922_v31, 2  ;;  %v955_v30 = vadd.f32 %v954_v51, %v2158_v44 }
 0x390   :  { %v904_v29 = vrot.slane %v903_v15, 1  ;;  %v917_v24 = vadd.f32 %v916_v17, %v915_v62  ;;  %v943_v60 = vadd.f32 %v942_v7, %v2164_v4  ;;  %v950_v34 = vadd.f32 %v949_v63, %v2166_v10 }
 0x391   :  { %v898_v32 = vadd.f32 %v897_v53, %v896_v18  ;;  %v911_v9 = vrot.slane %v910_v46, 1  ;;  %v924_v6 = vadd.f32 %v923_v28, %v922_v31  ;;  %v956_v61 = vrot.slane %v955_v30, 2 }
 0x392   :  { %v905_v39 = vadd.f32 %v904_v29, %v903_v15  ;;  %v918_v38 = vrot.slane %v917_v24, 1  ;;  %v944_v27 = vrot.slane %v943_v60, 1  ;;  %v951_v41 = vrot.slane %v950_v34, 1 }
 0x393   :  { %v912_v12 = vadd.f32 %v911_v9, %v910_v46  ;;  %v925_v1 = vrot.slane %v924_v6, 1  ;;  %v1108_v35 = vsel %vm1007_vm4, %v898_v32, %v1107_v59  ;;  %v957_v49 = vadd.f32 %v956_v61, %v955_v30 }
 0x394   :  { %v919_v44 = vadd.f32 %v918_v38, %v917_v24  ;;  %v1109_v51 = vsel %vm1009_vm5, %v905_v39, %v1108_v35  ;;  %v945_v40 = vadd.f32 %v944_v27, %v943_v60  ;;  %v952_v4 = vadd.f32 %v951_v41, %v950_v34 }
 0x395   :  { %v926_v23 = vadd.f32 %v925_v1, %v924_v6  ;;  %v1110_v10 = vsel %vm1011_vm6, %v912_v12, %v1109_v51  ;;  %v958_v2 = vrot.slane %v957_v49, 1  ;;  %v960_v22 = vsel %vm462_vm1, %v2148_v45, 0.0 }
 0x396   :  { %v1111_v19 = vsel %vm1013_vm7, %v919_v44, %v1110_v10  ;;  %v961_v21 = vrot.slane %v960_v22, 4  ;;  %v967_v33 = vsel %vm462_vm1, %v2152_v14, 0.0  ;;  %v974_v25 = vsel %vm462_vm1, %v936_v20, 0.0 }
 0x397   :  { %v2371_v36 = vsel %vm1015_vm8, %v926_v23, %v1111_v19  ;;  %v968_v55 = vrot.slane %v967_v33, 4  ;;  %v975_v42 = vrot.slane %v974_v25, 4  ;;  %v981_v48 = vsel %vm462_vm1, %v937_v11, 0.0 }
 0x398   :  { %1142 = vrot.lane.b32.xlu1 %v2371_v36, %s1669_s24  ;;  %v962_v5 = vadd.f32 %v961_v21, %v960_v22  ;;  %v988_v45 = vsel %vm462_vm1, %v938_v26, 0.0  ;;  %v982_v54 = vrot.slane %v981_v48, 4  ;;  %v959_v14 = vadd.f32 %v958_v2, %v957_v49 }
 0x399   :  { %v969_v56 = vadd.f32 %v968_v55, %v967_v33  ;;  %v976_v16 = vadd.f32 %v975_v42, %v974_v25  ;;  %v989_v58 = vrot.slane %v988_v45, 4  ;;  %v1122_v57 = vsel %vm1003_vm2, %v952_v4, %v945_v40 }
 0x39a   :  { %v963_v52 = vrot.slane %v962_v5, 2  ;;  %v983_v62 = vadd.f32 %v982_v54, %v981_v48  ;;  %v1123_v26 = vsel %vm1005_vm3, %v959_v14, %v1122_v57 }
 0x39b   :  { %v970_v59 = vrot.slane %v969_v56, 2  ;;  %v977_v47 = vrot.slane %v976_v16, 2  ;;  %v990_v20 = vadd.f32 %v989_v58, %v988_v45 }
 0x39c   :  { %v964_v18 = vadd.f32 %v963_v52, %v962_v5  ;;  %v984_v15 = vrot.slane %v983_v62, 2 }
 0x39d   :  { %v971_v8 = vadd.f32 %v970_v59, %v969_v56  ;;  %v978_v31 = vadd.f32 %v977_v47, %v976_v16  ;;  %v991_v17 = vrot.slane %v990_v20, 2 }
 0x39e   :  { %v965_v11 = vrot.slane %v964_v18, 1  ;;  %v985_v53 = vadd.f32 %v984_v15, %v983_v62 }
 0x39f   :  { %v972_v7 = vrot.slane %v971_v8, 1  ;;  %v979_v63 = vrot.slane %v978_v31, 1  ;;  %v992_v46 = vadd.f32 %v991_v17, %v990_v20 }
 0x3a0   :  { %v966_v28 = vadd.f32 %v965_v11, %v964_v18  ;;  %v986_v29 = vrot.slane %v985_v53, 1 }
 0x3a1   :  { %v973_v30 = vadd.f32 %v972_v7, %v971_v8  ;;  %v993_v24 = vrot.slane %v992_v46, 1  ;;  %v980_v60 = vadd.f32 %v979_v63, %v978_v31 }
 0x3a2   :  { %v1124_v34 = vsel %vm1007_vm4, %v966_v28, %v1123_v26  ;;  %v987_v32 = vadd.f32 %v986_v29, %v985_v53 }
 0x3a3   :  { %v1125_v9 = vsel %vm1009_vm5, %v973_v30, %v1124_v34  ;;  %v994_v6 = vadd.f32 %v993_v24, %v992_v46 }
 0x3a4   :  { %v1126_v61 = vsel %vm1011_vm6, %v980_v60, %v1125_v9 }
 0x3a5   :  { %v1127_v39 = vsel %vm1013_vm7, %v987_v32, %v1126_v61 }
 0x3a6   :  { %v2384_v38 = vsel %vm1015_vm8, %v994_v6, %v1127_v39 }
 0x3a7   :  { %1144 = vrot.lane.b32.xlu0 %v2384_v38, %s1669_s24 }
 0x3b0   :  { %v1131_v27 = vpop.permute.xlu1 %1130 }
 0x3b1   :  { %v1154_v41 = vsel %vm28_vm0, %v1131_v27, 0.0  ;;  %v1668_v27 = vld [vmem:[%s2544_s3 + $0x1] ss:$0 sm:$0xff] }
 0x3bc   :  { %1155 = vadd.xlane.f32.xlu1 %v1154_v41  ;;  %v1309_v41 = vld [vmem:[%s2546_s2] sm:$0xff] }
 0x3c1   :  { %v1133_v12 = vpop.permute.xlu0 %1132 }
 0x3c2   :  { %v1157_v1 = vsel %vm28_vm0, %v1133_v12, 0.0  ;;  %v1310_v12 = vld [vmem:[%s2546_s2 + $0x8] sm:$0xff] }
 0x3c6   :  { %1158 = vadd.xlane.f32.xlu0 %v1157_v1  ;;  %v1311_v1 = vld [vmem:[%s2546_s2 + $0x10] sm:$0xff] }
 0x3cf   :  { %v1135_v35 = vpop.permute.xlu1 %1134 }
 0x3d0   :  { %v1160_v49 = vsel %vm28_vm0, %v1135_v35, 0.0  ;;  %v1556_v35 = vpack.c.bf16 %v1310_v12, %v1309_v41 }
 0x3d1   :  { %1161 = vadd.xlane.f32.xlu0 %v1160_v49  ;;  %v1312_v49 = vld [vmem:[%s2546_s2 + $0x18] sm:$0xff] }
 0x3d2   :  { %1557 = vmatprep.subr.bf16.mxu1 %v1556_v35 }
 0x3d3   :  { %1559 = vmatpush3.bf16.msra.mxu1 %v1556_v35 }
 0x3de   :  { %v1137_v44 = vpop.permute.xlu0 %1136 }
 0x3df   :  { %v1163_v51 = vsel %vm28_vm0, %v1137_v44, 0.0  ;;  %v1560_v44 = vpack.c.bf16 %v1312_v49, %v1311_v1 }
 0x3e0   :  { %1164 = vadd.xlane.f32.xlu0 %v1163_v51 }
 0x3e1   :  { %1561 = vmatprep.subr.bf16.mxu1 %v1560_v44 }
 0x3e2   :  { %1563 = vmatpush3.bf16.msra.mxu1 %v1560_v44 }
 0x3ed   :  { %v1139_v40 = vpop.permute.xlu1 %1138 }
 0x3ee   :  { %v1166_v4 = vsel %vm28_vm0, %v1139_v40, 0.0 }
 0x3ef   :  { %1167 = vadd.xlane.f32.xlu1 %v1166_v4 }
 0x3fc   :  { %v1141_v23 = vpop.permute.xlu0 %1140 }
 0x3fd   :  { %v1169_v10 = vsel %vm28_vm0, %v1141_v23, 0.0 }
 0x3fe   :  { %1170 = vadd.xlane.f32.xlu0 %v1169_v10 }
 0x40a   :  { %v1143_v2 = vpop.permute.xlu1 %1142 }
 0x40b   :  { %v1172_v22 = vsel %vm28_vm0, %v1143_v2, 0.0 }
 0x40c   :  { %1173 = vadd.xlane.f32.xlu1 %v1172_v22 }
 0x419   :  { %v1145_v19 = vpop.permute.xlu0 %1144 }
 0x41a   :  { %v1175_v21 = vsel %vm28_vm0, %v1145_v19, 0.0 }
 0x41b   :  { %1176 = vadd.xlane.f32.xlu0 %v1175_v21 }
 0x449   :  { %v1156_v33 = vpop.xlane.xlu1 %1155 }
 0x44a   :  { %v1178_v25 = vmul.f32 0.03125, %v1156_v33 }
 0x44c   :  { %v2397_v55 = vsub.f32 %v2186_v3, %v1178_v25 }
 0x44e   :  { %v1194_v42 = vmul.f32 %v2397_v55, %v2397_v55 }
 0x450   :  { %1210 = vrot.lane.b32.xlu1 %v1194_v42, %s1669_s24 }
 0x453   :  { %v1159_v5 = vpop.xlane.xlu0 %1158 }
 0x454   :  { %v1179_v48 = vmul.f32 0.03125, %v1159_v5 }
 0x456   :  { %v2403_v45 = vsub.f32 %v2216_v13, %v1179_v48 }
 0x458   :  { %v1195_v56 = vmul.f32 %v2403_v45, %v2403_v45 }
 0x45a   :  { %1212 = vrot.lane.b32.xlu0 %v1195_v56, %s1669_s24 }
 0x45e   :  { %v1162_v16 = vpop.xlane.xlu0 %1161 }
 0x45f   :  { %v1180_v54 = vmul.f32 0.03125, %v1162_v16 }
 0x461   :  { %v2409_v3 = vsub.f32 %v2247_v0, %v1180_v54 }
 0x463   :  { %v1196_v58 = vmul.f32 %v2409_v3, %v2409_v3 }
 0x465   :  { %1214 = vrot.lane.b32.xlu1 %v1196_v58, %s1669_s24 }
 0x46d   :  { %v1165_v14 = vpop.xlane.xlu0 %1164 }
 0x46e   :  { %v1181_v52 = vmul.f32 0.03125, %v1165_v14 }
 0x470   :  { %v2415_v13 = vsub.f32 %v2279_v37, %v1181_v52 }
 0x472   :  { %v1197_v57 = vmul.f32 %v2415_v13, %v2415_v13 }
 0x474   :  { %1216 = vrot.lane.b32.xlu1 %v1197_v57, %s1669_s24 }
 0x47c   :  { %v1168_v59 = vpop.xlane.xlu1 %1167 }
 0x47d   :  { %v1182_v47 = vmul.f32 0.03125, %v1168_v59 }
 0x47f   :  { %v2421_v0 = vsub.f32 %v2309_v50, %v1182_v47 }
 0x481   :  { %v1198_v62 = vmul.f32 %v2421_v0, %v2421_v0 }
 0x483   :  { %1218 = vrot.lane.b32.xlu1 %v1198_v62, %s1669_s24 }
 0x48b   :  { %v1171_v20 = vpop.xlane.xlu0 %1170 }
 0x48c   :  { %v1183_v18 = vmul.f32 0.03125, %v1171_v20 }
 0x48e   :  { %v2427_v37 = vsub.f32 %v2341_v43, %v1183_v18 }
 0x490   :  { %v1199_v8 = vmul.f32 %v2427_v37, %v2427_v37 }
 0x492   :  { %1220 = vrot.lane.b32.xlu0 %v1199_v8, %s1669_s24 }
 0x499   :  { %v1174_v31 = vpop.xlane.xlu1 %1173 }
 0x49a   :  { %v1184_v15 = vmul.f32 0.03125, %v1174_v31 }
 0x49c   :  { %v2433_v50 = vsub.f32 %v2371_v36, %v1184_v15  ;;  %v2582_v15 = vld [vmem:[#allocation2_spill] sm:$0xff] }
 0x49e   :  { %v1200_v17 = vmul.f32 %v2433_v50, %v2433_v50 }
 0x4a0   :  { %1222 = vrot.lane.b32.xlu1 %v1200_v17, %s1669_s24 }
 0x4a8   :  { %v1177_v11 = vpop.xlane.xlu0 %1176 }
 0x4a9   :  { %v1185_v26 = vmul.f32 0.03125, %v1177_v11 }
 0x4ab   :  { %v2439_v43 = vsub.f32 %v2384_v38, %v1185_v26 }
 0x4ad   :  { %v1201_v7 = vmul.f32 %v2439_v43, %v2439_v43 }
 0x4af   :  { %1224 = vrot.lane.b32.xlu0 %v1201_v7, %s1669_s24 }
 0x4c2   :  { %v1211_v63 = vpop.permute.xlu1 %1210 }
 0x4c3   :  { %v1234_v53 = vsel %vm28_vm0, %v1211_v63, 0.0 }
 0x4c4   :  { %1235 = vadd.xlane.f32.xlu1 %v1234_v53 }
 0x4cc   :  { %v1213_v36 = vpop.permute.xlu0 %1212 }
 0x4cd   :  { %v1237_v46 = vsel %vm28_vm0, %v1213_v36, 0.0 }
 0x4ce   :  { %1238 = vadd.xlane.f32.xlu0 %v1237_v46 }
 0x4d7   :  { %v1215_v28 = vpop.permute.xlu1 %1214 }
 0x4d8   :  { %v1240_v30 = vsel %vm28_vm0, %v1215_v28, 0.0 }
 0x4d9   :  { %1241 = vadd.xlane.f32.xlu0 %v1240_v30 }
 0x4e6   :  { %v1217_v29 = vpop.permute.xlu1 %1216 }
 0x4e7   :  { %v1243_v24 = vsel %vm28_vm0, %v1217_v29, 0.0 }
 0x4e8   :  { %1244 = vadd.xlane.f32.xlu0 %v1243_v24 }
 0x4f5   :  { %v1219_v32 = vpop.permute.xlu1 %1218 }
 0x4f6   :  { %v1246_v61 = vsel %vm28_vm0, %v1219_v32, 0.0 }
 0x504   :  { %v1221_v60 = vpop.permute.xlu0 %1220 }
 0x505   :  { %v1249_v34 = vsel %vm28_vm0, %v1221_v60, 0.0 }
 0x506   :  { %1250 = vadd.xlane.f32.xlu0 %v1249_v34 }
 0x512   :  { %v1223_v9 = vpop.permute.xlu1 %1222 }
 0x513   :  { %v1252_v6 = vsel %vm28_vm0, %v1223_v9, 0.0 }
 0x514   :  { %1253 = vadd.xlane.f32.xlu1 %v1252_v6 }
 0x518   :  { %1247 = vadd.xlane.f32.xlu1 %v1246_v61 }
 0x521   :  { %v1225_v39 = vpop.permute.xlu0 %1224 }
 0x522   :  { %v1255_v38 = vsel %vm28_vm0, %v1225_v39, 0.0 }
 0x523   :  { %1256 = vadd.xlane.f32.xlu0 %v1255_v38 }
 0x529   :  { %1298 = vrot.lane.b32.xlu1 %v1668_v27, %s1671_s1 }
 0x551   :  { %v1236_v4 = vpop.xlane.xlu1 %1235 }
 0x552   :  { %v1258_v23 = vmul.f32 0.03125, %v1236_v4  ;;  %v2583_v4 = vld [vmem:[#allocation4_spill] sm:$0xff] }
 0x554   :  { %v1266_v19 = vadd.f32 1e-05, %v1258_v23  ;;  %v1494_v23 = vmul.f32 -1.442695, %v2583_v4 }
 0x556   :  { %1620 = vrsqrt.f32 %v1266_v19 }
 0x55b   :  { %v1239_v51 = vpop.xlane.xlu0 %1238 }
 0x55c   :  { %v1259_v10 = vmul.f32 0.03125, %v1239_v51 }
 0x55e   :  { %v1267_v21 = vadd.f32 1e-05, %v1259_v10  ;;  %v2584_v10 = vld [vmem:[#allocation3_spill] sm:$0xff] }
 0x560   :  { %1622 = vrsqrt.f32 %v1267_v21  ;;  %v1621_v16 = vpop.eup %1620  ;;  %v2586_v21 = vld [vmem:[#allocation6_spill] sm:$0xff] }
 0x561   :  { %v1282_v47 = vmul.f32 %v1621_v16, %v2397_v55 }
 0x563   :  { %v1290_v11 = vmul.f32 %v1282_v47, %v2582_v15  ;;  %v2589_v47 = vld [vmem:[#allocation9_spill] sm:$0xff] }
 0x566   :  { %v1242_v40 = vpop.xlane.xlu0 %1241 }
 0x567   :  { %v1260_v2 = vmul.f32 0.03125, %v1242_v40 }
 0x569   :  { %v1268_v33 = vadd.f32 1e-05, %v1260_v2  ;;  %v1492_v2 = vmul.f32 -1.442695, %v2584_v10 }
 0x56a   :  { %v1623_v54 = vpop.eup %1622 }
 0x56b   :  { %1624 = vrsqrt.f32 %v1268_v33  ;;  %v1283_v59 = vmul.f32 %v1623_v54, %v2403_v45  ;;  %v1498_v33 = vmul.f32 -1.442695, %v2586_v21 }
 0x56d   :  { %v1291_v17 = vmul.f32 %v1283_v59, %v2582_v15 }
 0x575   :  { %v1245_v22 = vpop.xlane.xlu0 %1244  ;;  %v1625_v14 = vpop.eup %1624 }
 0x576   :  { %v1261_v42 = vmul.f32 0.03125, %v1245_v22  ;;  %v1284_v20 = vmul.f32 %v1625_v14, %v2409_v3  ;;  %v2585_v22 = vld [vmem:[#allocation5_spill] sm:$0xff] }
 0x577   :  { %v1496_v19 = vmul.f32 -1.442695, %v2585_v22 }
 0x578   :  { %v1269_v48 = vadd.f32 1e-05, %v1261_v42  ;;  %v1292_v63 = vmul.f32 %v1284_v20, %v2582_v15  ;;  %v2590_v20 = vld [vmem:[#allocation7_spill] sm:$0xff] }
 0x57a   :  { %1626 = vrsqrt.f32 %v1269_v48 }
 0x584   :  { %v1627_v8 = vpop.eup %1626 }
 0x585   :  { %v1285_v55 = vmul.f32 %v1627_v8, %v2415_v13  ;;  %v1507_v8 = vld [vmem:[%s2544_s3 + $0x3] ss:$0 sm:$0xff] }
 0x587   :  { %v1293_v46 = vmul.f32 %v1285_v55, %v2582_v15 }
 0x593   :  { %v1251_v25 = vpop.xlane.xlu0 %1250 }
 0x594   :  { %v1263_v5 = vmul.f32 0.03125, %v1251_v25 }
 0x596   :  { %v1271_v56 = vadd.f32 1e-05, %v1263_v5  ;;  %v2587_v5 = vld [vmem:[#allocation10_spill] sm:$0xff] }
 0x597   :  { %v1502_v48 = vmul.f32 -1.442695, %v2587_v5 }
 0x598   :  { %1628 = vrsqrt.f32 %v1271_v56  ;;  %v2588_v56 = vld [vmem:[#allocation8_spill] sm:$0xff] }
 0x599   :  { %v1500_v16 = vmul.f32 -1.442695, %v2588_v56 }
 0x5a1   :  { %v1254_v58 = vpop.xlane.xlu1 %1253 }
 0x5a2   :  { %v1264_v52 = vmul.f32 0.03125, %v1254_v58  ;;  %v1629_v26 = vpop.eup %1628 }
 0x5a3   :  { %v1287_v3 = vmul.f32 %v1629_v26, %v2427_v37 }
 0x5a4   :  { %v1272_v57 = vadd.f32 1e-05, %v1264_v52 }
 0x5a5   :  { %v1248_v62 = vpop.xlane.xlu1 %1247  ;;  %v1295_v30 = vmul.f32 %v1287_v3, %v2582_v15 }
 0x5a6   :  { %v1262_v18 = vmul.f32 0.03125, %v1248_v62  ;;  %1630 = vrsqrt.f32 %v1272_v57  ;;  %v1506_v62 = vmul.f32 -1.442695, %v2589_v47 }
 0x5a8   :  { %v1270_v31 = vadd.f32 1e-05, %v1262_v18  ;;  %v1504_v18 = vmul.f32 -1.442695, %v2590_v20 }
 0x5a9   :  { %v1299_v7 = vpop.permute.xlu1 %1298 }
 0x5aa   :  { %1632 = vrsqrt.f32 %v1270_v31  ;;  %v1302_v53 = vadd.f32 %v1299_v7, %v1291_v17  ;;  %v1301_v45 = vadd.f32 %v1299_v7, %v1290_v11  ;;  %v1303_v36 = vadd.f32 %v1299_v7, %v1292_v63 }
 0x5ab   :  { %v1304_v60 = vadd.f32 %v1299_v7, %v1293_v46  ;;  %v1306_v13 = vadd.f32 %v1299_v7, %v1295_v30 }
 0x5ac   :  { %1327 = vrot.lane.b32.xlu1 %v1302_v53, %s1669_s24  ;;  %1325 = vrot.lane.b32.xlu0 %v1301_v45, %s1669_s24 }
 0x5b0   :  { %v1257_v28 = vpop.xlane.xlu0 %1256  ;;  %1329 = vrot.lane.b32.xlu1 %v1303_v36, %s1669_s24  ;;  %v1631_v24 = vpop.eup %1630 }
 0x5b1   :  { %v1265_v29 = vmul.f32 0.03125, %v1257_v28  ;;  %v1288_v37 = vmul.f32 %v1631_v24, %v2433_v50 }
 0x5b3   :  { %v1273_v34 = vadd.f32 1e-05, %v1265_v29  ;;  %v1296_v39 = vmul.f32 %v1288_v37, %v2582_v15 }
 0x5b4   :  { %v1633_v32 = vpop.eup %1632  ;;  %1331 = vrot.lane.b32.xlu1 %v1304_v60, %s1669_s24 }
 0x5b5   :  { %1634 = vrsqrt.f32 %v1273_v34  ;;  %v1286_v9 = vmul.f32 %v1633_v32, %v2421_v0  ;;  %v1307_v38 = vadd.f32 %v1299_v7, %v1296_v39 }
 0x5b6   :  { %1636 = vpow2.f32 %v1494_v23 }
 0x5b7   :  { %v1294_v6 = vmul.f32 %v1286_v9, %v2582_v15  ;;  %1638 = vpow2.f32 %v1492_v2 }
 0x5b8   :  { %1335 = vrot.lane.b32.xlu1 %v1306_v13, %s1669_s24  ;;  %1640 = vpow2.f32 %v1496_v19 }
 0x5b9   :  { %v1305_v61 = vadd.f32 %v1299_v7, %v1294_v6  ;;  %1642 = vpow2.f32 %v1498_v33 }
 0x5ba   :  { %1644 = vpow2.f32 %v1502_v48 }
 0x5bb   :  { %1333 = vrot.lane.b32.xlu0 %v1305_v61, %s1669_s24  ;;  %1646 = vpow2.f32 %v1500_v16 }
 0x5bf   :  { %v1635_v27 = vpop.eup %1634  ;;  %1337 = vrot.lane.b32.xlu0 %v1307_v38, %s1669_s24 }
 0x5c0   :  { %v1289_v41 = vmul.f32 %v1635_v27, %v2439_v43  ;;  %v1637_v25 = vpop.eup %1636 }
 0x5c1   :  { %v1639_v42 = vpop.eup %1638  ;;  %v365_v54 = vadd.f32 1.0, %v1637_v25 }
 0x5c2   :  { %v1297_v12 = vmul.f32 %v1289_v41, %v2582_v15  ;;  %v363_v58 = vadd.f32 1.0, %v1639_v42  ;;  %v1641_v14 = vpop.eup %1640 }
 0x5c3   :  { %v1643_v52 = vpop.eup %1642  ;;  %1648 = vrcp.f32 %v365_v54  ;;  %v367_v57 = vadd.f32 1.0, %v1641_v14 }
 0x5c4   :  { %v1308_v0 = vadd.f32 %v1299_v7, %v1297_v12  ;;  %1650 = vrcp.f32 %v363_v58  ;;  %v369_v59 = vadd.f32 1.0, %v1643_v52  ;;  %v1645_v31 = vpop.eup %1644 }
 0x5c5   :  { %1652 = vrcp.f32 %v367_v57  ;;  %v1647_v17 = vpop.eup %1646  ;;  %v373_v45 = vadd.f32 1.0, %v1645_v31 }
 0x5c6   :  { %1339 = vrot.lane.b32.xlu1 %v1308_v0, %s1669_s24  ;;  %1654 = vrcp.f32 %v369_v59  ;;  %v371_v3 = vadd.f32 1.0, %v1647_v17 }
 0x5c7   :  { %1656 = vpow2.f32 %v1506_v62 }
 0x5c8   :  { %1658 = vpow2.f32 %v1504_v18 }
 0x5c9   :  { %1660 = vrcp.f32 %v373_v45 }
 0x5ca   :  { %1662 = vrcp.f32 %v371_v3 }
 0x5cd   :  { %v1649_v7 = vpop.eup %1648 }
 0x5ce   :  { %v1651_v53 = vpop.eup %1650 }
 0x5cf   :  { %v1653_v28 = vpop.eup %1652 }
 0x5d0   :  { %v1655_v24 = vpop.eup %1654 }
 0x5d1   :  { %v1657_v34 = vpop.eup %1656 }
 0x5d2   :  { %v1659_v13 = vpop.eup %1658  ;;  %v377_v37 = vadd.f32 1.0, %v1657_v34 }
 0x5d3   :  { %v375_v6 = vadd.f32 1.0, %v1659_v13  ;;  %v1661_v27 = vpop.eup %1660 }
 0x5d4   :  { %1664 = vrcp.f32 %v377_v37  ;;  %v1663_v12 = vpop.eup %1662 }
 0x5d5   :  { %1666 = vrcp.f32 %v375_v6 }
 0x61e   :  { %v1328_v50 = vpop.permute.xlu1 %1327  ;;  %v1326_v1 = vpop.permute.xlu0 %1325 }
 0x61f   :  { %1536 = vmatprep.mubr.msk.f32.mxu1 %vm28_vm0, %v1326_v1 }
 0x620   :  { %1537 = vmatmul.mubr.msk.f32.vlgmr.msra.gmra.mrb[4].mxu1 %vm28_vm0, %v1328_v50 }
 0x622   :  { %v1330_v35 = vpop.permute.xlu1 %1329 }
 0x623   :  { %1539 = vmatprep.mubr.msk.f32.mxu1 %vm28_vm0, %v1330_v35 }
 0x626   :  { %v1332_v49 = vpop.permute.xlu1 %1331 }
 0x627   :  { %1540 = vmatmul.mubr.msk.f32.gmra.mrb[6].mxu1 %vm28_vm0, %v1332_v49 }
 0x62a   :  { %v1336_v51 = vpop.permute.xlu1 %1335 }
 0x62d   :  { %v1334_v44 = vpop.permute.xlu0 %1333 }
 0x62e   :  { %1542 = vmatprep.mubr.msk.f32.mxu1 %vm28_vm0, %v1334_v44  ;;  %v1665_v44 = vpop.eup %1664 }
 0x62f   :  { %1543 = vmatmul.mubr.msk.f32.gmra.mrb[8].mxu1 %vm28_vm0, %v1336_v51 }
 0x631   :  { %v1338_v43 = vpop.permute.xlu0 %1337 }
 0x632   :  { %1545 = vmatprep.mubr.msk.f32.mxu1 %vm28_vm0, %v1338_v43  ;;  %v1667_v43 = vpop.eup %1666 }
 0x638   :  { %v1340_v40 = vpop.permute.xlu1 %1339 }
 0x639   :  { %1546 = vmatmul.mubr.msk.f32.gmra.mrb[10].mxu1 %vm28_vm0, %v1340_v40 }
 0x6f3   :  { %v1538_v15 = vpop.f32.mrb[4].mxu1 }
 0x6f4   :  { %v1429_v11 = vadd.f32 %v1538_v15, %v1507_v8  ;;  %v1423_v26 = vpop.f32.mrb[5].mxu1 }
 0x6f5   :  { %v1424_v63 = vadd.f32 %v1507_v8, %v1423_v26 }
 0x6f6   :  { %v1463_v55 = vmul.f32 %v1649_v7, %v1429_v11 }
 0x6f7   :  { %v1462_v36 = vmul.f32 %v1651_v53, %v1424_v63 }
 0x6f8   :  { %1471 = vst.msk [vmem:[%s2547_s4 + $0x8] sm:$0xff] %vm28_vm0, %v1463_v55 }
 0x6f9   :  { %1470 = vst.msk [vmem:[%s2547_s4] sm:$0xff] %vm28_vm0, %v1462_v36 }
 0x6fa   :  { %v1541_v46 = vpop.f32.mrb[6].mxu1 }
 0x6fb   :  { %v1439_v30 = vadd.f32 %v1541_v46, %v1507_v8  ;;  %v1433_v29 = vpop.f32.mrb[7].mxu1 }
 0x6fc   :  { %v1434_v60 = vadd.f32 %v1507_v8, %v1433_v29 }
 0x6fd   :  { %v1465_v32 = vmul.f32 %v1655_v24, %v1439_v30 }
 0x6fe   :  { %v1464_v9 = vmul.f32 %v1653_v28, %v1434_v60 }
 0x6ff   :  { %1473 = vst.msk [vmem:[%s2547_s4 + $0x18] sm:$0xff] %vm28_vm0, %v1465_v32 }
 0x700   :  { %1472 = vst.msk [vmem:[%s2547_s4 + $0x10] sm:$0xff] %vm28_vm0, %v1464_v9 }
 0x702   :  { %v1544_v61 = vpop.f32.mrb[8].mxu1 }
 0x703   :  { %v1449_v39 = vadd.f32 %v1544_v61, %v1507_v8  ;;  %v1443_v38 = vpop.f32.mrb[9].mxu1 }
 0x704   :  { %v1444_v41 = vadd.f32 %v1507_v8, %v1443_v38 }
 0x705   :  { %v1467_v0 = vmul.f32 %v1661_v27, %v1449_v39 }
 0x706   :  { %v1466_v50 = vmul.f32 %v1663_v12, %v1444_v41 }
 0x707   :  { %1475 = vst.msk [vmem:[%s2547_s4 + $0x28] sm:$0xff] %vm28_vm0, %v1467_v0 }
 0x708   :  { %1474 = vst.msk [vmem:[%s2547_s4 + $0x20] sm:$0xff] %vm28_vm0, %v1466_v50 }
 0x70c   :  { %v1547_v1 = vpop.f32.mrb[10].mxu1 }
 0x70d   :  { %v1459_v35 = vadd.f32 %v1547_v1, %v1507_v8  ;;  %v1453_v49 = vpop.f32.mrb[11].mxu1 }
 0x70e   :  { %v1454_v51 = vadd.f32 %v1507_v8, %v1453_v49 }
 0x70f   :  { %v1469_v40 = vmul.f32 %v1665_v44, %v1459_v35 }
 0x710   :  { %v1468_v4 = vmul.f32 %v1667_v43, %v1454_v51 }
 0x711   :  { %1477 = vst.msk [vmem:[%s2547_s4 + $0x38] sm:$0xff] %vm28_vm0, %v1469_v40 }
 0x712   :  { %1476 = vst.msk [vmem:[%s2547_s4 + $0x30] sm:$0xff] %vm28_vm0, %v1468_v4 }

</bundles_post_ra>
